<compile_context>
chip_gen: v7x
topology: tpu7x:2x2x1
jax: 0.10.0
libtpu: 0.0.40
codegen_flags: <defaults>
</compile_context>

<pallas_src>
import functools

import jax
import jax.numpy as jnp
import numpy as np
from jax import lax
from jax.experimental import pallas as pl
from jax.experimental.pallas import tpu as pltpu

LN_EPS = 1e-5
SQRT_HALF = 0.7071067811865476

# bf16 operands hit native MXU throughput on v5e/v6e/v7x and halve weight
# DMA/VMEM; accumulation is always f32 (preferred_element_type).
MATMUL_DTYPE = jnp.bfloat16


def _c(t):
    return t.astype(MATMUL_DTYPE)


def _layernorm(x, gamma, beta):
    mean = jnp.mean(x, axis=-1, keepdims=True)
    var = jnp.mean(jnp.square(x - mean), axis=-1, keepdims=True)
    return (x - mean) * lax.rsqrt(var + LN_EPS) * gamma + beta


def _erf(x):
    # Abramowitz & Stegun 7.1.26 rational approximation (|err| < 1.5e-7),
    # built only from ops that lower cleanly in Mosaic.
    a1, a2, a3, a4, a5 = 0.254829592, -0.284496736, 1.421413741, -1.453152027, 1.061405429
    p = 0.3275911
    z = jnp.abs(x)
    t = 1.0 / (1.0 + p * z)
    poly = ((((a5 * t + a4) * t + a3) * t + a2) * t + a1) * t
    pos = 1.0 - poly * jnp.exp(-z * z)
    return jnp.where(x >= 0.0, pos, -pos)


def _gelu_exact(x):
    # PyTorch nn.GELU() default (approximate='none'): 0.5*x*(1 + erf(x/sqrt(2)))
    return 0.5 * x * (1.0 + _erf(x * SQRT_HALF))


# ---------------------------------------------------------------------------
# Fused transformer kernel.
# grid = (batch_tiles [parallel], depth [arbitrary], mlp_tiles [arbitrary]).
# Activation for the current batch tile lives in VMEM scratch across all
# (depth, mlp_tile) steps; the FF second matmul accumulates over mlp tiles.
# NOTE: the resident-scratch pattern relies on depth/mlp being the inner
# (per-core sequential) grid axes; do not reorder the grid.
# ---------------------------------------------------------------------------

def _transformer_kernel(x_ref, ln1g_ref, ln1b_ref, wqkv_ref, wo_ref, bo_ref,
                        ln2g_ref, ln2b_ref, w1_ref, b1_ref, w2_ref, b2_ref,
                        lnfg_ref, lnfb_ref,
                        o_ref, act_ref, ffacc_ref,
                        *, heads, dim_head, b_tile, n_real, n_pad):
    l = pl.program_id(1)
    g = pl.program_id(2)
    inner = heads * dim_head

    # Load the input activation for this batch tile once (layer 0, tile 0).
    @pl.when(jnp.logical_and(l == 0, g == 0))
    def _load_input():
        act_ref[...] = x_ref[...].astype(jnp.float32)

    # ---------------- Attention block (once per layer, at mlp-tile 0) ------
    @pl.when(g == 0)
    def _attention():
        x = act_ref[...]                                          # (M, D) f32
        xn = _layernorm(x, ln1g_ref[0, 0], ln1b_ref[0, 0])

        # Fused, lane-dense QKV projection: (M, D) @ (D, 3*H*dh).
        # The 1/sqrt(dh) scale is already folded into the Q columns.
        qkv = jnp.dot(_c(xn), wqkv_ref[0],
                      preferred_element_type=jnp.float32)         # (M, 3I) f32

        if n_real < n_pad:
            # Mask padded key positions so padding never leaks into real rows.
            key_idx = lax.broadcasted_iota(jnp.int32, (n_pad, n_pad), 1)
            pad_mask = jnp.where(key_idx < n_real, 0.0, -1e30).astype(jnp.float32)
        else:
            pad_mask = None

        # Attention core on 2-D per-(batch-element, head) tiles; no
        # transposes/relayouts (batched dot_general serializes on MXU anyway).
        ctx_rows = []
        for b in range(b_tile):
            rows = slice(b * n_pad, (b + 1) * n_pad)
            ctx_heads = []
            for h in range(heads):
                c0 = h * dim_head
                q = _c(qkv[rows, c0:c0 + dim_head])               # (N, dh)
                k = _c(qkv[rows, inner + c0:inner + c0 + dim_head])
                v = _c(qkv[rows, 2 * inner + c0:2 * inner + c0 + dim_head])
                dots = jnp.einsum('nd,md->nm', q, k,
                                  preferred_element_type=jnp.float32)
                if pad_mask is not None:
                    dots = dots + pad_mask
                dots = dots - jnp.max(dots, axis=-1, keepdims=True)
                e = jnp.exp(dots)
                attn = e * pl.reciprocal(jnp.sum(e, axis=-1, keepdims=True),
                                         approx=True)
                ctx_heads.append(jnp.einsum('nm,md->nd', _c(attn), v,
                                            preferred_element_type=jnp.float32))
            ctx_rows.append(jnp.concatenate(ctx_heads, axis=-1))   # (N, I)
        ctx = jnp.concatenate(ctx_rows, axis=0)                    # (M, I)

        # Fused output projection: (M, H*dh) @ (H*dh, D), then residual.
        attn_out = jnp.dot(_c(ctx), wo_ref[0],
                           preferred_element_type=jnp.float32)     # (M, D)
        act_ref[...] = attn_out + bo_ref[0, 0] + x
        ffacc_ref[...] = jnp.zeros_like(ffacc_ref)

    # ---------------- FeedForward: partial matmul over current mlp tile ----
    x = act_ref[...]
    yn = _layernorm(x, ln2g_ref[0, 0], ln2b_ref[0, 0])
    hmid = jnp.dot(_c(yn), w1_ref[0],
                   preferred_element_type=jnp.float32) + b1_ref[0, 0]
    hmid = _gelu_exact(hmid)
    ffacc_ref[...] += jnp.dot(_c(hmid), w2_ref[0],
                              preferred_element_type=jnp.float32)

    last_g = g == pl.num_programs(2) - 1

    @pl.when(last_g)
    def _ff_residual():
        act_ref[...] = ffacc_ref[...] + b2_ref[0, 0] + act_ref[...]

    # Final LayerNorm + single HBM writeback per batch tile.
    @pl.when(jnp.logical_and(last_g, l == pl.num_programs(1) - 1))
    def _final_writeback():
        o_ref[...] = _layernorm(act_ref[...], lnfg_ref[0],
                                lnfb_ref[0]).astype(o_ref.dtype)


# ---------------------------------------------------------------------------
# Wrapper helpers
# ---------------------------------------------------------------------------

def _round_up(v, m):
    return (v + m - 1) // m * m


def _pick_batch_tile(batch, n_pad, target_rows=256):
    """Batch-tile so the matmul M dim approaches an MXU-friendly row count,
    while keeping >=2 batch-grid entries when possible (v7x megacore)."""
    bt = max(1, min(batch, max(1, target_rows // n_pad)))
    while batch % bt != 0:
        bt -= 1
    if batch // bt < 2 and batch >= 2:
        bt = max(1, bt // 2)
        while batch % bt != 0:
            bt -= 1
    return bt


def _pick_mlp_tile(mlp_dim):
    if mlp_dim <= 512:
        return mlp_dim
    tile = 512
    while mlp_dim % tile != 0 and tile > 8:
        tile //= 2
    return tile if mlp_dim % tile == 0 else mlp_dim


def _vmem_limit_bytes(*, m2, d, inner, mlp_tile, n_pad, b_tile, heads):
    bpe_w = 2 if MATMUL_DTYPE == jnp.bfloat16 else 4
    w = d * 3 * inner + inner * d + d * mlp_tile + mlp_tile * d
    small = 9 * d + 2 * mlp_tile
    blocks = 2 * (w * bpe_w + small * 4)            # double-buffered weights
    io = 2 * 2 * (m2 * d * 4)                       # x + out blocks (dbl-buf)
    scratch = 2 * (m2 * d * 4)                      # act + ffacc
    temps = (4 * m2 * max(3 * inner, mlp_tile, d) * 4
             + b_tile * heads * n_pad * n_pad * 4)
    total = int((blocks + io + scratch + temps) * 1.5)
    # Clamp: >= v6e scoped default, <= v7x per-TC physical VMEM.
    return int(min(max(total, 32 * 1024 * 1024), 64 * 1024 * 1024))


def _prepare_params(p, *, dim_head):
    """One-time: fold 1/sqrt(dh) into the Q columns; cast matmul weights bf16."""
    inner = p["w_qkv"].shape[-1] // 3
    scale = dim_head ** -0.5
    w_qkv = p["w_qkv"].at[:, :, :inner].multiply(scale)
    return dict(
        p,
        w_qkv=w_qkv.astype(MATMUL_DTYPE),
        w_o=p["w_o"].astype(MATMUL_DTYPE),
        w1=p["w1"].astype(MATMUL_DTYPE),
        w2=p["w2"].astype(MATMUL_DTYPE),
    )


def transformer_forward(x, params, *, heads, dim_head,
                        batch_tile=None, mlp_tile=None):
    B, N, D = x.shape
    depth = params["w_qkv"].shape[0]
    mlp_dim = params["w1"].shape[-1]
    inner = heads * dim_head

    n_pad = _round_up(N, 8)
    if batch_tile is None:
        batch_tile = _pick_batch_tile(B, n_pad)
    if mlp_tile is None:
        mlp_tile = _pick_mlp_tile(mlp_dim)
    n_mlp = mlp_dim // mlp_tile
    m2 = batch_tile * n_pad

    pp = _prepare_params(params, dim_head=dim_head)

    xp = x if n_pad == N else jnp.pad(x, ((0, 0), (0, n_pad - N), (0, 0)))
    x2 = xp.reshape(B * n_pad, D)          # lane-dense 2-D layout for the kernel

    kernel = functools.partial(_transformer_kernel, heads=heads,
                               dim_head=dim_head, b_tile=batch_tile,
                               n_real=N, n_pad=n_pad)

    l_map = lambda bt, l, g: (l, 0, 0)
    in_specs = [
        pl.BlockSpec((m2, D), lambda bt, l, g: (bt, 0)),               # x
        pl.BlockSpec((1, 1, D), l_map),                                # ln1_g
        pl.BlockSpec((1, 1, D), l_map),                                # ln1_b
        pl.BlockSpec((1, D, 3 * inner), l_map),                        # w_qkv
        pl.BlockSpec((1, inner, D), l_map),                            # w_o
        pl.BlockSpec((1, 1, D), l_map),                                # b_o
        pl.BlockSpec((1, 1, D), l_map),                                # ln2_g
        pl.BlockSpec((1, 1, D), l_map),                                # ln2_b
        pl.BlockSpec((1, D, mlp_tile), lambda bt, l, g: (l, 0, g)),    # w1
        pl.BlockSpec((1, 1, mlp_tile), lambda bt, l, g: (l, 0, g)),    # b1
        pl.BlockSpec((1, mlp_tile, D), lambda bt, l, g: (l, g, 0)),    # w2
        pl.BlockSpec((1, 1, D), l_map),                                # b2
        pl.BlockSpec((1, D), lambda bt, l, g: (0, 0)),                 # lnf_g
        pl.BlockSpec((1, D), lambda bt, l, g: (0, 0)),                 # lnf_b
    ]
    out_spec = pl.BlockSpec((m2, D), lambda bt, l, g: (bt, 0))

    vmem_bytes = _vmem_limit_bytes(m2=m2, d=D, inner=inner, mlp_tile=mlp_tile,
                                   n_pad=n_pad, b_tile=batch_tile, heads=heads)

    out2 = pl.pallas_call(
        kernel,
        out_shape=jax.ShapeDtypeStruct((B * n_pad, D), x.dtype),
        grid=(B // batch_tile, depth, n_mlp),
        in_specs=in_specs,
        out_specs=out_spec,
        scratch_shapes=[pltpu.VMEM((m2, D), jnp.float32),     # resident activation
                        pltpu.VMEM((m2, D), jnp.float32)],    # FF accumulator
        compiler_params=pltpu.CompilerParams(
            dimension_semantics=("parallel", "arbitrary", "arbitrary"),
            vmem_limit_bytes=vmem_bytes),
    )(x2, pp["ln1_g"], pp["ln1_b"], pp["w_qkv"], pp["w_o"], pp["b_o"],
      pp["ln2_g"], pp["ln2_b"], pp["w1"], pp["b1"], pp["w2"], pp["b2"],
      pp["lnf_g"], pp["lnf_b"])

    out = out2.reshape(B, n_pad, D)
    if n_pad != N:
        out = out[:, :N, :]
    return out


# ---------------------------------------------------------------------------
# Deterministic parameter init (weights stacked on a leading depth axis,
# QKV fused into a single (dim, 3*heads*dim_head) projection as in to_qkv).
# ---------------------------------------------------------------------------

def init_params(key, *, dim, depth, heads, dim_head, mlp_dim):
    f32 = jnp.float32
    inner = heads * dim_head
    ks = jax.random.split(key, 13)

    def nrm(k, shape, s=0.05):
        return s * jax.random.normal(k, shape, f32)

    return dict(
        ln1_g=1.0 + 0.1 * jax.random.normal(ks[0], (depth, 1, dim), f32),
        ln1_b=0.1 * jax.random.normal(ks[1], (depth, 1, dim), f32),
        w_qkv=nrm(ks[2], (depth, dim, 3 * inner)),
        w_o=nrm(ks[3], (depth, inner, dim)),
        b_o=nrm(ks[4], (depth, 1, dim)),
        ln2_g=1.0 + 0.1 * jax.random.normal(ks[5], (depth, 1, dim), f32),
        ln2_b=0.1 * jax.random.normal(ks[6], (depth, 1, dim), f32),
        w1=nrm(ks[7], (depth, dim, mlp_dim)),
        b1=nrm(ks[8], (depth, 1, mlp_dim)),
        w2=nrm(ks[9], (depth, mlp_dim, dim)),
        b2=nrm(ks[10], (depth, 1, dim)),
        lnf_g=1.0 + 0.1 * jax.random.normal(ks[11], (1, dim), f32),
        lnf_b=0.1 * jax.random.normal(ks[12], (1, dim), f32),
    )


# ---------------------------------------------------------------------------
# Pure-JAX f32 reference mirroring the PyTorch forward exactly.
# ---------------------------------------------------------------------------

def transformer_reference(x, p, *, heads, dim_head):
    def ln(t, g, b):
        mean = t.mean(-1, keepdims=True)
        var = jnp.square(t - mean).mean(-1, keepdims=True)
        return (t - mean) / jnp.sqrt(var + LN_EPS) * g + b

    B, N, D = x.shape
    scale = dim_head ** -0.5
    depth = p["w_qkv"].shape[0]
    inner = heads * dim_head

    for l in range(depth):
        xn = ln(x, p["ln1_g"][l, 0], p["ln1_b"][l, 0])
        qkv = xn @ p["w_qkv"][l]                              # (B, N, 3I)
        q, k, v = jnp.split(qkv, 3, axis=-1)

        def split_heads(t):
            return t.reshape(B, N, heads, dim_head).transpose(0, 2, 1, 3)

        q, k, v = map(split_heads, (q, k, v))
        dots = jnp.einsum("bhnd,bhmd->bhnm", q, k) * scale
        attn = jax.nn.softmax(dots, axis=-1)
        out = jnp.einsum("bhnm,bhmd->bhnd", attn, v)
        out = out.transpose(0, 2, 1, 3).reshape(B, N, inner)
        x = out @ p["w_o"][l] + p["b_o"][l, 0] + x

        yn = ln(x, p["ln2_g"][l, 0], p["ln2_b"][l, 0])
        h = jax.nn.gelu(yn @ p["w1"][l] + p["b1"][l, 0], approximate=False)
        x = h @ p["w2"][l] + p["b2"][l, 0] + x

    return ln(x, p["lnf_g"][0], p["lnf_b"][0])


if __name__ == "__main__":
    # small shapes: batch=4, seq=8, dim=32, depth=2, heads=4, dim_head=8, mlp_dim=64
    B, N = 4, 8
    dim, depth, heads, dim_head, mlp_dim = 32, 2, 4, 8, 64

    key = jax.random.PRNGKey(0)
    kx, kp = jax.random.split(key)
    x = jax.random.normal(kx, (B, N, dim), jnp.float32)
    params = init_params(kp, dim=dim, depth=depth, heads=heads,
                         dim_head=dim_head, mlp_dim=mlp_dim)

    out = transformer_forward(x, params, heads=heads, dim_head=dim_head)
    out = jax.block_until_ready(out)

    ref = transformer_reference(x, params, heads=heads, dim_head=dim_head)
    out_np, ref_np = np.asarray(out), np.asarray(ref)
    max_err = float(np.max(np.abs(out_np - ref_np)))
    # bf16 matmul operands vs f32 reference -> loosened tolerance (see review).
    if not np.allclose(out_np, ref_np, rtol=2e-2, atol=2e-2):
        raise AssertionError(
            f"Pallas Transformer output mismatch vs JAX reference (max|err|={max_err})")
    print("KERNEL_OK")
</pallas_src>

<mosaic_0001>
module attributes {stable_mosaic.version = 11 : i64} {
  func.func @_transformer_kernel(%arg0: i32, %arg1: i32, %arg2: i32, %arg3: memref<16x32xf32, #tpu.memory_space<vmem>>, %arg4: memref<1x1x32xf32, #tpu.memory_space<vmem>>, %arg5: memref<1x1x32xf32, #tpu.memory_space<vmem>>, %arg6: memref<1x32x96xbf16, #tpu.memory_space<vmem>>, %arg7: memref<1x32x32xbf16, #tpu.memory_space<vmem>>, %arg8: memref<1x1x32xf32, #tpu.memory_space<vmem>>, %arg9: memref<1x1x32xf32, #tpu.memory_space<vmem>>, %arg10: memref<1x1x32xf32, #tpu.memory_space<vmem>>, %arg11: memref<1x32x64xbf16, #tpu.memory_space<vmem>>, %arg12: memref<1x1x64xf32, #tpu.memory_space<vmem>>, %arg13: memref<1x64x32xbf16, #tpu.memory_space<vmem>>, %arg14: memref<1x1x32xf32, #tpu.memory_space<vmem>>, %arg15: memref<1x32xf32, #tpu.memory_space<vmem>>, %arg16: memref<1x32xf32, #tpu.memory_space<vmem>>, %arg17: memref<16x32xf32, #tpu.memory_space<vmem>>, %arg18: memref<16x32xf32, #tpu.memory_space<vmem>>, %arg19: memref<16x32xf32, #tpu.memory_space<vmem>>) attributes {dimension_semantics = [#tpu.dimension_semantics<parallel>, #tpu.dimension_semantics<arbitrary>, #tpu.dimension_semantics<arbitrary>], iteration_bounds = array<i64: 2, 2, 1>, scalar_prefetch = 0 : i64, scratch_operands = 2 : i64, tpu.core_type = #tpu.core_type<tc>, window_params = [{transform_indices = @transform_0, window_bounds = array<i64: 16, 32>}, {transform_indices = @transform_1, window_bounds = array<i64: 1, 1, 32>}, {transform_indices = @transform_2, window_bounds = array<i64: 1, 1, 32>}, {transform_indices = @transform_3, window_bounds = array<i64: 1, 32, 96>}, {transform_indices = @transform_4, window_bounds = array<i64: 1, 32, 32>}, {transform_indices = @transform_5, window_bounds = array<i64: 1, 1, 32>}, {transform_indices = @transform_6, window_bounds = array<i64: 1, 1, 32>}, {transform_indices = @transform_7, window_bounds = array<i64: 1, 1, 32>}, {transform_indices = @transform_8, window_bounds = array<i64: 1, 32, 64>}, {transform_indices = @transform_9, window_bounds = array<i64: 1, 1, 64>}, {transform_indices = @transform_10, window_bounds = array<i64: 1, 64, 32>}, {transform_indices = @transform_11, window_bounds = array<i64: 1, 1, 32>}, {pipeline_mode = #tpu.pipeline_mode<synchronous>, transform_indices = @transform_12, window_bounds = array<i64: 1, 32>}, {pipeline_mode = #tpu.pipeline_mode<synchronous>, transform_indices = @transform_13, window_bounds = array<i64: 1, 32>}, {transform_indices = @transform_14, window_bounds = array<i64: 16, 32>}]} {
    %c0_i32 = arith.constant 0 : i32
    %0 = arith.cmpi eq, %arg1, %c0_i32 : i32
    %c0_i32_0 = arith.constant 0 : i32
    %1 = arith.cmpi eq, %arg2, %c0_i32_0 : i32
    %2 = arith.andi %0, %1 : i1
    %3 = arith.extui %2 : i1 to i32
    %c0_i32_1 = arith.constant 0 : i32
    %4 = arith.cmpi ne, %3, %c0_i32_1 : i32
    scf.if %4 {
      %c0_48 = arith.constant 0 : index
      %c0_49 = arith.constant 0 : index
      %100 = vector.load %arg3[%c0_48, %c0_49] : memref<16x32xf32, #tpu.memory_space<vmem>>, vector<16x32xf32>
      %c0_50 = arith.constant 0 : index
      %c0_51 = arith.constant 0 : index
      %101 = vector.load %arg18[%c0_50, %c0_51] : memref<16x32xf32, #tpu.memory_space<vmem>>, vector<16x32xf32>
      tpu.vector_store %arg18[%c0_50, %c0_51], %100 {strides = array<i32>} : memref<16x32xf32, #tpu.memory_space<vmem>>, vector<16x32xf32>,
    } else {
    }
    %c0_i32_2 = arith.constant 0 : i32
    %5 = arith.cmpi eq, %arg2, %c0_i32_2 : i32
    %6 = arith.extui %5 : i1 to i32
    %c0_i32_3 = arith.constant 0 : i32
    %7 = arith.cmpi ne, %6, %c0_i32_3 : i32
    scf.if %7 {
      %c0_48 = arith.constant 0 : index
      %c0_49 = arith.constant 0 : index
      %100 = vector.load %arg18[%c0_48, %c0_49] : memref<16x32xf32, #tpu.memory_space<vmem>>, vector<16x32xf32>
      %c0_50 = arith.constant 0 : index
      %c0_51 = arith.constant 0 : index
      %c0_52 = arith.constant 0 : index
      %101 = vector.load %arg4[%c0_50, %c0_51, %c0_52] : memref<1x1x32xf32, #tpu.memory_space<vmem>>, vector<1x1x32xf32>
      %102 = vector.shape_cast %101 : vector<1x1x32xf32> to vector<32xf32>
      %c0_53 = arith.constant 0 : index
      %c0_54 = arith.constant 0 : index
      %c0_55 = arith.constant 0 : index
      %103 = vector.load %arg5[%c0_53, %c0_54, %c0_55] : memref<1x1x32xf32, #tpu.memory_space<vmem>>, vector<1x1x32xf32>
      %104 = vector.shape_cast %103 : vector<1x1x32xf32> to vector<32xf32>
      %cst_56 = arith.constant dense<0.000000e+00> : vector<16xf32>
      %105 = vector.multi_reduction <add>, %100, %cst_56 [1] : vector<16x32xf32> to vector<16xf32>
      %106 = vector.shape_cast %105 : vector<16xf32> to vector<16x1xf32>
      %cst_57 = arith.constant 3.200000e+01 : f32
      %107 = vector.broadcast %cst_57 : f32 to vector<16x1xf32>
      %108 = arith.divf %106, %107 : vector<16x1xf32>
      %109 = vector.broadcast %108 : vector<16x1xf32> to vector<16x32xf32>
      %110 = arith.subf %100, %109 : vector<16x32xf32>
      %111 = arith.mulf %110, %110 : vector<16x32xf32>
      %cst_58 = arith.constant dense<0.000000e+00> : vector<16xf32>
      %112 = vector.multi_reduction <add>, %111, %cst_58 [1] : vector<16x32xf32> to vector<16xf32>
      %113 = vector.shape_cast %112 : vector<16xf32> to vector<16x1xf32>
      %cst_59 = arith.constant 3.200000e+01 : f32
      %114 = vector.broadcast %cst_59 : f32 to vector<16x1xf32>
      %115 = arith.divf %113, %114 : vector<16x1xf32>
      %116 = vector.broadcast %108 : vector<16x1xf32> to vector<16x32xf32>
      %117 = arith.subf %100, %116 : vector<16x32xf32>
      %cst_60 = arith.constant 9.99999974E-6 : f32
      %118 = vector.broadcast %cst_60 : f32 to vector<16x1xf32>
      %119 = arith.addf %115, %118 : vector<16x1xf32>
      %120 = math.rsqrt %119 : vector<16x1xf32>
      %121 = vector.broadcast %120 : vector<16x1xf32> to vector<16x32xf32>
      %122 = arith.mulf %117, %121 : vector<16x32xf32>
      %123 = vector.shape_cast %102 : vector<32xf32> to vector<1x32xf32>
      %124 = vector.broadcast %123 : vector<1x32xf32> to vector<16x32xf32>
      %125 = arith.mulf %122, %124 : vector<16x32xf32>
      %126 = vector.shape_cast %104 : vector<32xf32> to vector<1x32xf32>
      %127 = vector.broadcast %126 : vector<1x32xf32> to vector<16x32xf32>
      %128 = arith.addf %125, %127 : vector<16x32xf32>
      %129 = arith.truncf %128 : vector<16x32xf32> to vector<16x32xbf16>
      %c0_61 = arith.constant 0 : index
      %c0_62 = arith.constant 0 : index
      %c0_63 = arith.constant 0 : index
      %130 = vector.load %arg6[%c0_61, %c0_62, %c0_63] : memref<1x32x96xbf16, #tpu.memory_space<vmem>>, vector<1x32x96xbf16>
      %131 = vector.shape_cast %130 : vector<1x32x96xbf16> to vector<32x96xbf16>
      %cst_64 = arith.constant dense<0.000000e+00> : vector<16x96xf32>
      %132 = tpu.matmul %129, %131, %cst_64 {dimension_numbers = #tpu.dot_dimension_numbers<[1], [0], [0], [1], [0, 0, 1, 1], [], []>} : vector<16x32xbf16>, vector<32x96xbf16>, vector<16x96xf32> -> vector<16x96xf32>
      %133 = vector.extract_strided_slice %132 {offsets = [0, 0], sizes = [8, 8], strides = [1, 1]} : vector<16x96xf32> to vector<8x8xf32>
      %134 = arith.truncf %133 : vector<8x8xf32> to vector<8x8xbf16>
      %135 = vector.extract_strided_slice %132 {offsets = [0, 32], sizes = [8, 8], strides = [1, 1]} : vector<16x96xf32> to vector<8x8xf32>
      %136 = arith.truncf %135 : vector<8x8xf32> to vector<8x8xbf16>
      %137 = vector.extract_strided_slice %132 {offsets = [0, 64], sizes = [8, 8], strides = [1, 1]} : vector<16x96xf32> to vector<8x8xf32>
      %138 = arith.truncf %137 : vector<8x8xf32> to vector<8x8xbf16>
      "tpu.trace_start"() <{level = 10 : i32, message = "nd,md->nm"}> : () -> ()
      %cst_65 = arith.constant dense<0.000000e+00> : vector<8x8xf32>
      %139 = tpu.matmul %134, %136, %cst_65 {dimension_numbers = #tpu.dot_dimension_numbers<[1], [1], [0], [0], [0, 0, 1, 0], [], []>} : vector<8x8xbf16>, vector<8x8xbf16>, vector<8x8xf32> -> vector<8x8xf32>
      "tpu.trace_stop"() : () -> ()
      %cst_66 = arith.constant dense<0xFF800000> : vector<8xf32>
      %140 = vector.multi_reduction <maximumf>, %139, %cst_66 [1] : vector<8x8xf32> to vector<8xf32>
      %141 = vector.shape_cast %140 : vector<8xf32> to vector<8x1xf32>
      %142 = vector.broadcast %141 : vector<8x1xf32> to vector<8x8xf32>
      %143 = arith.subf %139, %142 : vector<8x8xf32>
      %144 = math.exp %143 : vector<8x8xf32>
      %cst_67 = arith.constant dense<0.000000e+00> : vector<8xf32>
      %145 = vector.multi_reduction <add>, %144, %cst_67 [1] : vector<8x8xf32> to vector<8xf32>
      %146 = vector.shape_cast %145 : vector<8xf32> to vector<8x1xf32>
      %147 = tpu.reciprocal %146 {approx = true} : vector<8x1xf32> -> vector<8x1xf32>
      %148 = vector.broadcast %147 : vector<8x1xf32> to vector<8x8xf32>
      %149 = arith.mulf %144, %148 : vector<8x8xf32>
      %150 = arith.truncf %149 : vector<8x8xf32> to vector<8x8xbf16>
      "tpu.trace_start"() <{level = 10 : i32, message = "nm,md->nd"}> : () -> ()
      %cst_68 = arith.constant dense<0.000000e+00> : vector<8x8xf32>
      %151 = tpu.matmul %150, %138, %cst_68 {dimension_numbers = #tpu.dot_dimension_numbers<[1], [0], [0], [1], [0, 0, 1, 1], [], []>} : vector<8x8xbf16>, vector<8x8xbf16>, vector<8x8xf32> -> vector<8x8xf32>
      "tpu.trace_stop"() : () -> ()
      %152 = vector.extract_strided_slice %132 {offsets = [0, 8], sizes = [8, 8], strides = [1, 1]} : vector<16x96xf32> to vector<8x8xf32>
      %153 = arith.truncf %152 : vector<8x8xf32> to vector<8x8xbf16>
      %154 = vector.extract_strided_slice %132 {offsets = [0, 40], sizes = [8, 8], strides = [1, 1]} : vector<16x96xf32> to vector<8x8xf32>
      %155 = arith.truncf %154 : vector<8x8xf32> to vector<8x8xbf16>
      %156 = vector.extract_strided_slice %132 {offsets = [0, 72], sizes = [8, 8], strides = [1, 1]} : vector<16x96xf32> to vector<8x8xf32>
      %157 = arith.truncf %156 : vector<8x8xf32> to vector<8x8xbf16>
      "tpu.trace_start"() <{level = 10 : i32, message = "nd,md->nm"}> : () -> ()
      %cst_69 = arith.constant dense<0.000000e+00> : vector<8x8xf32>
      %158 = tpu.matmul %153, %155, %cst_69 {dimension_numbers = #tpu.dot_dimension_numbers<[1], [1], [0], [0], [0, 0, 1, 0], [], []>} : vector<8x8xbf16>, vector<8x8xbf16>, vector<8x8xf32> -> vector<8x8xf32>
      "tpu.trace_stop"() : () -> ()
      %cst_70 = arith.constant dense<0xFF800000> : vector<8xf32>
      %159 = vector.multi_reduction <maximumf>, %158, %cst_70 [1] : vector<8x8xf32> to vector<8xf32>
      %160 = vector.shape_cast %159 : vector<8xf32> to vector<8x1xf32>
      %161 = vector.broadcast %160 : vector<8x1xf32> to vector<8x8xf32>
      %162 = arith.subf %158, %161 : vector<8x8xf32>
      %163 = math.exp %162 : vector<8x8xf32>
      %cst_71 = arith.constant dense<0.000000e+00> : vector<8xf32>
      %164 = vector.multi_reduction <add>, %163, %cst_71 [1] : vector<8x8xf32> to vector<8xf32>
      %165 = vector.shape_cast %164 : vector<8xf32> to vector<8x1xf32>
      %166 = tpu.reciprocal %165 {approx = true} : vector<8x1xf32> -> vector<8x1xf32>
      %167 = vector.broadcast %166 : vector<8x1xf32> to vector<8x8xf32>
      %168 = arith.mulf %163, %167 : vector<8x8xf32>
      %169 = arith.truncf %168 : vector<8x8xf32> to vector<8x8xbf16>
      "tpu.trace_start"() <{level = 10 : i32, message = "nm,md->nd"}> : () -> ()
      %cst_72 = arith.constant dense<0.000000e+00> : vector<8x8xf32>
      %170 = tpu.matmul %169, %157, %cst_72 {dimension_numbers = #tpu.dot_dimension_numbers<[1], [0], [0], [1], [0, 0, 1, 1], [], []>} : vector<8x8xbf16>, vector<8x8xbf16>, vector<8x8xf32> -> vector<8x8xf32>
      "tpu.trace_stop"() : () -> ()
      %171 = vector.extract_strided_slice %132 {offsets = [0, 16], sizes = [8, 8], strides = [1, 1]} : vector<16x96xf32> to vector<8x8xf32>
      %172 = arith.truncf %171 : vector<8x8xf32> to vector<8x8xbf16>
      %173 = vector.extract_strided_slice %132 {offsets = [0, 48], sizes = [8, 8], strides = [1, 1]} : vector<16x96xf32> to vector<8x8xf32>
      %174 = arith.truncf %173 : vector<8x8xf32> to vector<8x8xbf16>
      %175 = vector.extract_strided_slice %132 {offsets = [0, 80], sizes = [8, 8], strides = [1, 1]} : vector<16x96xf32> to vector<8x8xf32>
      %176 = arith.truncf %175 : vector<8x8xf32> to vector<8x8xbf16>
      "tpu.trace_start"() <{level = 10 : i32, message = "nd,md->nm"}> : () -> ()
      %cst_73 = arith.constant dense<0.000000e+00> : vector<8x8xf32>
      %177 = tpu.matmul %172, %174, %cst_73 {dimension_numbers = #tpu.dot_dimension_numbers<[1], [1], [0], [0], [0, 0, 1, 0], [], []>} : vector<8x8xbf16>, vector<8x8xbf16>, vector<8x8xf32> -> vector<8x8xf32>
      "tpu.trace_stop"() : () -> ()
      %cst_74 = arith.constant dense<0xFF800000> : vector<8xf32>
      %178 = vector.multi_reduction <maximumf>, %177, %cst_74 [1] : vector<8x8xf32> to vector<8xf32>
      %179 = vector.shape_cast %178 : vector<8xf32> to vector<8x1xf32>
      %180 = vector.broadcast %179 : vector<8x1xf32> to vector<8x8xf32>
      %181 = arith.subf %177, %180 : vector<8x8xf32>
      %182 = math.exp %181 : vector<8x8xf32>
      %cst_75 = arith.constant dense<0.000000e+00> : vector<8xf32>
      %183 = vector.multi_reduction <add>, %182, %cst_75 [1] : vector<8x8xf32> to vector<8xf32>
      %184 = vector.shape_cast %183 : vector<8xf32> to vector<8x1xf32>
      %185 = tpu.reciprocal %184 {approx = true} : vector<8x1xf32> -> vector<8x1xf32>
      %186 = vector.broadcast %185 : vector<8x1xf32> to vector<8x8xf32>
      %187 = arith.mulf %182, %186 : vector<8x8xf32>
      %188 = arith.truncf %187 : vector<8x8xf32> to vector<8x8xbf16>
      "tpu.trace_start"() <{level = 10 : i32, message = "nm,md->nd"}> : () -> ()
      %cst_76 = arith.constant dense<0.000000e+00> : vector<8x8xf32>
      %189 = tpu.matmul %188, %176, %cst_76 {dimension_numbers = #tpu.dot_dimension_numbers<[1], [0], [0], [1], [0, 0, 1, 1], [], []>} : vector<8x8xbf16>, vector<8x8xbf16>, vector<8x8xf32> -> vector<8x8xf32>
      "tpu.trace_stop"() : () -> ()
      %190 = vector.extract_strided_slice %132 {offsets = [0, 24], sizes = [8, 8], strides = [1, 1]} : vector<16x96xf32> to vector<8x8xf32>
      %191 = arith.truncf %190 : vector<8x8xf32> to vector<8x8xbf16>
      %192 = vector.extract_strided_slice %132 {offsets = [0, 56], sizes = [8, 8], strides = [1, 1]} : vector<16x96xf32> to vector<8x8xf32>
      %193 = arith.truncf %192 : vector<8x8xf32> to vector<8x8xbf16>
      %194 = vector.extract_strided_slice %132 {offsets = [0, 88], sizes = [8, 8], strides = [1, 1]} : vector<16x96xf32> to vector<8x8xf32>
      %195 = arith.truncf %194 : vector<8x8xf32> to vector<8x8xbf16>
      "tpu.trace_start"() <{level = 10 : i32, message = "nd,md->nm"}> : () -> ()
      %cst_77 = arith.constant dense<0.000000e+00> : vector<8x8xf32>
      %196 = tpu.matmul %191, %193, %cst_77 {dimension_numbers = #tpu.dot_dimension_numbers<[1], [1], [0], [0], [0, 0, 1, 0], [], []>} : vector<8x8xbf16>, vector<8x8xbf16>, vector<8x8xf32> -> vector<8x8xf32>
      "tpu.trace_stop"() : () -> ()
      %cst_78 = arith.constant dense<0xFF800000> : vector<8xf32>
      %197 = vector.multi_reduction <maximumf>, %196, %cst_78 [1] : vector<8x8xf32> to vector<8xf32>
      %198 = vector.shape_cast %197 : vector<8xf32> to vector<8x1xf32>
      %199 = vector.broadcast %198 : vector<8x1xf32> to vector<8x8xf32>
      %200 = arith.subf %196, %199 : vector<8x8xf32>
      %201 = math.exp %200 : vector<8x8xf32>
      %cst_79 = arith.constant dense<0.000000e+00> : vector<8xf32>
      %202 = vector.multi_reduction <add>, %201, %cst_79 [1] : vector<8x8xf32> to vector<8xf32>
      %203 = vector.shape_cast %202 : vector<8xf32> to vector<8x1xf32>
      %204 = tpu.reciprocal %203 {approx = true} : vector<8x1xf32> -> vector<8x1xf32>
      %205 = vector.broadcast %204 : vector<8x1xf32> to vector<8x8xf32>
      %206 = arith.mulf %201, %205 : vector<8x8xf32>
      %207 = arith.truncf %206 : vector<8x8xf32> to vector<8x8xbf16>
      "tpu.trace_start"() <{level = 10 : i32, message = "nm,md->nd"}> : () -> ()
      %cst_80 = arith.constant dense<0.000000e+00> : vector<8x8xf32>
      %208 = tpu.matmul %207, %195, %cst_80 {dimension_numbers = #tpu.dot_dimension_numbers<[1], [0], [0], [1], [0, 0, 1, 1], [], []>} : vector<8x8xbf16>, vector<8x8xbf16>, vector<8x8xf32> -> vector<8x8xf32>
      "tpu.trace_stop"() : () -> ()
      %209 = tpu.concatenate %151, %170, %189, %208 in 1 : vector<8x8xf32>, vector<8x8xf32>, vector<8x8xf32>, vector<8x8xf32> -> vector<8x32xf32>
      %210 = vector.extract_strided_slice %132 {offsets = [8, 0], sizes = [8, 8], strides = [1, 1]} : vector<16x96xf32> to vector<8x8xf32>
      %211 = arith.truncf %210 : vector<8x8xf32> to vector<8x8xbf16>
      %212 = vector.extract_strided_slice %132 {offsets = [8, 32], sizes = [8, 8], strides = [1, 1]} : vector<16x96xf32> to vector<8x8xf32>
      %213 = arith.truncf %212 : vector<8x8xf32> to vector<8x8xbf16>
      %214 = vector.extract_strided_slice %132 {offsets = [8, 64], sizes = [8, 8], strides = [1, 1]} : vector<16x96xf32> to vector<8x8xf32>
      %215 = arith.truncf %214 : vector<8x8xf32> to vector<8x8xbf16>
      "tpu.trace_start"() <{level = 10 : i32, message = "nd,md->nm"}> : () -> ()
      %cst_81 = arith.constant dense<0.000000e+00> : vector<8x8xf32>
      %216 = tpu.matmul %211, %213, %cst_81 {dimension_numbers = #tpu.dot_dimension_numbers<[1], [1], [0], [0], [0, 0, 1, 0], [], []>} : vector<8x8xbf16>, vector<8x8xbf16>, vector<8x8xf32> -> vector<8x8xf32>
      "tpu.trace_stop"() : () -> ()
      %cst_82 = arith.constant dense<0xFF800000> : vector<8xf32>
      %217 = vector.multi_reduction <maximumf>, %216, %cst_82 [1] : vector<8x8xf32> to vector<8xf32>
      %218 = vector.shape_cast %217 : vector<8xf32> to vector<8x1xf32>
      %219 = vector.broadcast %218 : vector<8x1xf32> to vector<8x8xf32>
      %220 = arith.subf %216, %219 : vector<8x8xf32>
      %221 = math.exp %220 : vector<8x8xf32>
      %cst_83 = arith.constant dense<0.000000e+00> : vector<8xf32>
      %222 = vector.multi_reduction <add>, %221, %cst_83 [1] : vector<8x8xf32> to vector<8xf32>
      %223 = vector.shape_cast %222 : vector<8xf32> to vector<8x1xf32>
      %224 = tpu.reciprocal %223 {approx = true} : vector<8x1xf32> -> vector<8x1xf32>
      %225 = vector.broadcast %224 : vector<8x1xf32> to vector<8x8xf32>
      %226 = arith.mulf %221, %225 : vector<8x8xf32>
      %227 = arith.truncf %226 : vector<8x8xf32> to vector<8x8xbf16>
      "tpu.trace_start"() <{level = 10 : i32, message = "nm,md->nd"}> : () -> ()
      %cst_84 = arith.constant dense<0.000000e+00> : vector<8x8xf32>
      %228 = tpu.matmul %227, %215, %cst_84 {dimension_numbers = #tpu.dot_dimension_numbers<[1], [0], [0], [1], [0, 0, 1, 1], [], []>} : vector<8x8xbf16>, vector<8x8xbf16>, vector<8x8xf32> -> vector<8x8xf32>
      "tpu.trace_stop"() : () -> ()
      %229 = vector.extract_strided_slice %132 {offsets = [8, 8], sizes = [8, 8], strides = [1, 1]} : vector<16x96xf32> to vector<8x8xf32>
      %230 = arith.truncf %229 : vector<8x8xf32> to vector<8x8xbf16>
      %231 = vector.extract_strided_slice %132 {offsets = [8, 40], sizes = [8, 8], strides = [1, 1]} : vector<16x96xf32> to vector<8x8xf32>
      %232 = arith.truncf %231 : vector<8x8xf32> to vector<8x8xbf16>
      %233 = vector.extract_strided_slice %132 {offsets = [8, 72], sizes = [8, 8], strides = [1, 1]} : vector<16x96xf32> to vector<8x8xf32>
      %234 = arith.truncf %233 : vector<8x8xf32> to vector<8x8xbf16>
      "tpu.trace_start"() <{level = 10 : i32, message = "nd,md->nm"}> : () -> ()
      %cst_85 = arith.constant dense<0.000000e+00> : vector<8x8xf32>
      %235 = tpu.matmul %230, %232, %cst_85 {dimension_numbers = #tpu.dot_dimension_numbers<[1], [1], [0], [0], [0, 0, 1, 0], [], []>} : vector<8x8xbf16>, vector<8x8xbf16>, vector<8x8xf32> -> vector<8x8xf32>
      "tpu.trace_stop"() : () -> ()
      %cst_86 = arith.constant dense<0xFF800000> : vector<8xf32>
      %236 = vector.multi_reduction <maximumf>, %235, %cst_86 [1] : vector<8x8xf32> to vector<8xf32>
      %237 = vector.shape_cast %236 : vector<8xf32> to vector<8x1xf32>
      %238 = vector.broadcast %237 : vector<8x1xf32> to vector<8x8xf32>
      %239 = arith.subf %235, %238 : vector<8x8xf32>
      %240 = math.exp %239 : vector<8x8xf32>
      %cst_87 = arith.constant dense<0.000000e+00> : vector<8xf32>
      %241 = vector.multi_reduction <add>, %240, %cst_87 [1] : vector<8x8xf32> to vector<8xf32>
      %242 = vector.shape_cast %241 : vector<8xf32> to vector<8x1xf32>
      %243 = tpu.reciprocal %242 {approx = true} : vector<8x1xf32> -> vector<8x1xf32>
      %244 = vector.broadcast %243 : vector<8x1xf32> to vector<8x8xf32>
      %245 = arith.mulf %240, %244 : vector<8x8xf32>
      %246 = arith.truncf %245 : vector<8x8xf32> to vector<8x8xbf16>
      "tpu.trace_start"() <{level = 10 : i32, message = "nm,md->nd"}> : () -> ()
      %cst_88 = arith.constant dense<0.000000e+00> : vector<8x8xf32>
      %247 = tpu.matmul %246, %234, %cst_88 {dimension_numbers = #tpu.dot_dimension_numbers<[1], [0], [0], [1], [0, 0, 1, 1], [], []>} : vector<8x8xbf16>, vector<8x8xbf16>, vector<8x8xf32> -> vector<8x8xf32>
      "tpu.trace_stop"() : () -> ()
      %248 = vector.extract_strided_slice %132 {offsets = [8, 16], sizes = [8, 8], strides = [1, 1]} : vector<16x96xf32> to vector<8x8xf32>
      %249 = arith.truncf %248 : vector<8x8xf32> to vector<8x8xbf16>
      %250 = vector.extract_strided_slice %132 {offsets = [8, 48], sizes = [8, 8], strides = [1, 1]} : vector<16x96xf32> to vector<8x8xf32>
      %251 = arith.truncf %250 : vector<8x8xf32> to vector<8x8xbf16>
      %252 = vector.extract_strided_slice %132 {offsets = [8, 80], sizes = [8, 8], strides = [1, 1]} : vector<16x96xf32> to vector<8x8xf32>
      %253 = arith.truncf %252 : vector<8x8xf32> to vector<8x8xbf16>
      "tpu.trace_start"() <{level = 10 : i32, message = "nd,md->nm"}> : () -> ()
      %cst_89 = arith.constant dense<0.000000e+00> : vector<8x8xf32>
      %254 = tpu.matmul %249, %251, %cst_89 {dimension_numbers = #tpu.dot_dimension_numbers<[1], [1], [0], [0], [0, 0, 1, 0], [], []>} : vector<8x8xbf16>, vector<8x8xbf16>, vector<8x8xf32> -> vector<8x8xf32>
      "tpu.trace_stop"() : () -> ()
      %cst_90 = arith.constant dense<0xFF800000> : vector<8xf32>
      %255 = vector.multi_reduction <maximumf>, %254, %cst_90 [1] : vector<8x8xf32> to vector<8xf32>
      %256 = vector.shape_cast %255 : vector<8xf32> to vector<8x1xf32>
      %257 = vector.broadcast %256 : vector<8x1xf32> to vector<8x8xf32>
      %258 = arith.subf %254, %257 : vector<8x8xf32>
      %259 = math.exp %258 : vector<8x8xf32>
      %cst_91 = arith.constant dense<0.000000e+00> : vector<8xf32>
      %260 = vector.multi_reduction <add>, %259, %cst_91 [1] : vector<8x8xf32> to vector<8xf32>
      %261 = vector.shape_cast %260 : vector<8xf32> to vector<8x1xf32>
      %262 = tpu.reciprocal %261 {approx = true} : vector<8x1xf32> -> vector<8x1xf32>
      %263 = vector.broadcast %262 : vector<8x1xf32> to vector<8x8xf32>
      %264 = arith.mulf %259, %263 : vector<8x8xf32>
      %265 = arith.truncf %264 : vector<8x8xf32> to vector<8x8xbf16>
      "tpu.trace_start"() <{level = 10 : i32, message = "nm,md->nd"}> : () -> ()
      %cst_92 = arith.constant dense<0.000000e+00> : vector<8x8xf32>
      %266 = tpu.matmul %265, %253, %cst_92 {dimension_numbers = #tpu.dot_dimension_numbers<[1], [0], [0], [1], [0, 0, 1, 1], [], []>} : vector<8x8xbf16>, vector<8x8xbf16>, vector<8x8xf32> -> vector<8x8xf32>
      "tpu.trace_stop"() : () -> ()
      %267 = vector.extract_strided_slice %132 {offsets = [8, 24], sizes = [8, 8], strides = [1, 1]} : vector<16x96xf32> to vector<8x8xf32>
      %268 = arith.truncf %267 : vector<8x8xf32> to vector<8x8xbf16>
      %269 = vector.extract_strided_slice %132 {offsets = [8, 56], sizes = [8, 8], strides = [1, 1]} : vector<16x96xf32> to vector<8x8xf32>
      %270 = arith.truncf %269 : vector<8x8xf32> to vector<8x8xbf16>
      %271 = vector.extract_strided_slice %132 {offsets = [8, 88], sizes = [8, 8], strides = [1, 1]} : vector<16x96xf32> to vector<8x8xf32>
      %272 = arith.truncf %271 : vector<8x8xf32> to vector<8x8xbf16>
      "tpu.trace_start"() <{level = 10 : i32, message = "nd,md->nm"}> : () -> ()
      %cst_93 = arith.constant dense<0.000000e+00> : vector<8x8xf32>
      %273 = tpu.matmul %268, %270, %cst_93 {dimension_numbers = #tpu.dot_dimension_numbers<[1], [1], [0], [0], [0, 0, 1, 0], [], []>} : vector<8x8xbf16>, vector<8x8xbf16>, vector<8x8xf32> -> vector<8x8xf32>
      "tpu.trace_stop"() : () -> ()
      %cst_94 = arith.constant dense<0xFF800000> : vector<8xf32>
      %274 = vector.multi_reduction <maximumf>, %273, %cst_94 [1] : vector<8x8xf32> to vector<8xf32>
      %275 = vector.shape_cast %274 : vector<8xf32> to vector<8x1xf32>
      %276 = vector.broadcast %275 : vector<8x1xf32> to vector<8x8xf32>
      %277 = arith.subf %273, %276 : vector<8x8xf32>
      %278 = math.exp %277 : vector<8x8xf32>
      %cst_95 = arith.constant dense<0.000000e+00> : vector<8xf32>
      %279 = vector.multi_reduction <add>, %278, %cst_95 [1] : vector<8x8xf32> to vector<8xf32>
      %280 = vector.shape_cast %279 : vector<8xf32> to vector<8x1xf32>
      %281 = tpu.reciprocal %280 {approx = true} : vector<8x1xf32> -> vector<8x1xf32>
      %282 = vector.broadcast %281 : vector<8x1xf32> to vector<8x8xf32>
      %283 = arith.mulf %278, %282 : vector<8x8xf32>
      %284 = arith.truncf %283 : vector<8x8xf32> to vector<8x8xbf16>
      "tpu.trace_start"() <{level = 10 : i32, message = "nm,md->nd"}> : () -> ()
      %cst_96 = arith.constant dense<0.000000e+00> : vector<8x8xf32>
      %285 = tpu.matmul %284, %272, %cst_96 {dimension_numbers = #tpu.dot_dimension_numbers<[1], [0], [0], [1], [0, 0, 1, 1], [], []>} : vector<8x8xbf16>, vector<8x8xbf16>, vector<8x8xf32> -> vector<8x8xf32>
      "tpu.trace_stop"() : () -> ()
      %286 = tpu.concatenate %228, %247, %266, %285 in 1 : vector<8x8xf32>, vector<8x8xf32>, vector<8x8xf32>, vector<8x8xf32> -> vector<8x32xf32>
      %287 = tpu.concatenate %209, %286 in 0 : vector<8x32xf32>, vector<8x32xf32> -> vector<16x32xf32>
      %288 = arith.truncf %287 : vector<16x32xf32> to vector<16x32xbf16>
      %c0_97 = arith.constant 0 : index
      %c0_98 = arith.constant 0 : index
      %c0_99 = arith.constant 0 : index
      %289 = vector.load %arg7[%c0_97, %c0_98, %c0_99] : memref<1x32x32xbf16, #tpu.memory_space<vmem>>, vector<1x32x32xbf16>
      %290 = vector.shape_cast %289 : vector<1x32x32xbf16> to vector<32x32xbf16>
      %cst_100 = arith.constant dense<0.000000e+00> : vector<16x32xf32>
      %291 = tpu.matmul %288, %290, %cst_100 {dimension_numbers = #tpu.dot_dimension_numbers<[1], [0], [0], [1], [0, 0, 1, 1], [], []>} : vector<16x32xbf16>, vector<32x32xbf16>, vector<16x32xf32> -> vector<16x32xf32>
      %c0_101 = arith.constant 0 : index
      %c0_102 = arith.constant 0 : index
      %c0_103 = arith.constant 0 : index
      %292 = vector.load %arg8[%c0_101, %c0_102, %c0_103] : memref<1x1x32xf32, #tpu.memory_space<vmem>>, vector<1x1x32xf32>
      %293 = vector.shape_cast %292 : vector<1x1x32xf32> to vector<32xf32>
      %294 = vector.shape_cast %293 : vector<32xf32> to vector<1x32xf32>
      %295 = vector.broadcast %294 : vector<1x32xf32> to vector<16x32xf32>
      %296 = arith.addf %291, %295 : vector<16x32xf32>
      %297 = arith.addf %296, %100 : vector<16x32xf32>
      %c0_104 = arith.constant 0 : index
      %c0_105 = arith.constant 0 : index
      %298 = vector.load %arg18[%c0_104, %c0_105] : memref<16x32xf32, #tpu.memory_space<vmem>>, vector<16x32xf32>
      tpu.vector_store %arg18[%c0_104, %c0_105], %297 {strides = array<i32>} : memref<16x32xf32, #tpu.memory_space<vmem>>, vector<16x32xf32>,
      %cst_106 = arith.constant 0.000000e+00 : f32
      %299 = vector.broadcast %cst_106 : f32 to vector<16x32xf32>
      %c0_107 = arith.constant 0 : index
      %c0_108 = arith.constant 0 : index
      %300 = vector.load %arg19[%c0_107, %c0_108] : memref<16x32xf32, #tpu.memory_space<vmem>>, vector<16x32xf32>
      tpu.vector_store %arg19[%c0_107, %c0_108], %299 {strides = array<i32>} : memref<16x32xf32, #tpu.memory_space<vmem>>, vector<16x32xf32>,
    } else {
    }
    %c0 = arith.constant 0 : index
    %c0_4 = arith.constant 0 : index
    %8 = vector.load %arg18[%c0, %c0_4] : memref<16x32xf32, #tpu.memory_space<vmem>>, vector<16x32xf32>
    %c0_5 = arith.constant 0 : index
    %c0_6 = arith.constant 0 : index
    %c0_7 = arith.constant 0 : index
    %9 = vector.load %arg9[%c0_5, %c0_6, %c0_7] : memref<1x1x32xf32, #tpu.memory_space<vmem>>, vector<1x1x32xf32>
    %10 = vector.shape_cast %9 : vector<1x1x32xf32> to vector<32xf32>
    %c0_8 = arith.constant 0 : index
    %c0_9 = arith.constant 0 : index
    %c0_10 = arith.constant 0 : index
    %11 = vector.load %arg10[%c0_8, %c0_9, %c0_10] : memref<1x1x32xf32, #tpu.memory_space<vmem>>, vector<1x1x32xf32>
    %12 = vector.shape_cast %11 : vector<1x1x32xf32> to vector<32xf32>
    %cst = arith.constant dense<0.000000e+00> : vector<16xf32>
    %13 = vector.multi_reduction <add>, %8, %cst [1] : vector<16x32xf32> to vector<16xf32>
    %14 = vector.shape_cast %13 : vector<16xf32> to vector<16x1xf32>
    %cst_11 = arith.constant 3.200000e+01 : f32
    %15 = vector.broadcast %cst_11 : f32 to vector<16x1xf32>
    %16 = arith.divf %14, %15 : vector<16x1xf32>
    %17 = vector.broadcast %16 : vector<16x1xf32> to vector<16x32xf32>
    %18 = arith.subf %8, %17 : vector<16x32xf32>
    %19 = arith.mulf %18, %18 : vector<16x32xf32>
    %cst_12 = arith.constant dense<0.000000e+00> : vector<16xf32>
    %20 = vector.multi_reduction <add>, %19, %cst_12 [1] : vector<16x32xf32> to vector<16xf32>
    %21 = vector.shape_cast %20 : vector<16xf32> to vector<16x1xf32>
    %cst_13 = arith.constant 3.200000e+01 : f32
    %22 = vector.broadcast %cst_13 : f32 to vector<16x1xf32>
    %23 = arith.divf %21, %22 : vector<16x1xf32>
    %24 = vector.broadcast %16 : vector<16x1xf32> to vector<16x32xf32>
    %25 = arith.subf %8, %24 : vector<16x32xf32>
    %cst_14 = arith.constant 9.99999974E-6 : f32
    %26 = vector.broadcast %cst_14 : f32 to vector<16x1xf32>
    %27 = arith.addf %23, %26 : vector<16x1xf32>
    %28 = math.rsqrt %27 : vector<16x1xf32>
    %29 = vector.broadcast %28 : vector<16x1xf32> to vector<16x32xf32>
    %30 = arith.mulf %25, %29 : vector<16x32xf32>
    %31 = vector.shape_cast %10 : vector<32xf32> to vector<1x32xf32>
    %32 = vector.broadcast %31 : vector<1x32xf32> to vector<16x32xf32>
    %33 = arith.mulf %30, %32 : vector<16x32xf32>
    %34 = vector.shape_cast %12 : vector<32xf32> to vector<1x32xf32>
    %35 = vector.broadcast %34 : vector<1x32xf32> to vector<16x32xf32>
    %36 = arith.addf %33, %35 : vector<16x32xf32>
    %37 = arith.truncf %36 : vector<16x32xf32> to vector<16x32xbf16>
    %c0_15 = arith.constant 0 : index
    %c0_16 = arith.constant 0 : index
    %c0_17 = arith.constant 0 : index
    %38 = vector.load %arg11[%c0_15, %c0_16, %c0_17] : memref<1x32x64xbf16, #tpu.memory_space<vmem>>, vector<1x32x64xbf16>
    %39 = vector.shape_cast %38 : vector<1x32x64xbf16> to vector<32x64xbf16>
    %cst_18 = arith.constant dense<0.000000e+00> : vector<16x64xf32>
    %40 = tpu.matmul %37, %39, %cst_18 {dimension_numbers = #tpu.dot_dimension_numbers<[1], [0], [0], [1], [0, 0, 1, 1], [], []>} : vector<16x32xbf16>, vector<32x64xbf16>, vector<16x64xf32> -> vector<16x64xf32>
    %c0_19 = arith.constant 0 : index
    %c0_20 = arith.constant 0 : index
    %c0_21 = arith.constant 0 : index
    %41 = vector.load %arg12[%c0_19, %c0_20, %c0_21] : memref<1x1x64xf32, #tpu.memory_space<vmem>>, vector<1x1x64xf32>
    %42 = vector.shape_cast %41 : vector<1x1x64xf32> to vector<64xf32>
    %43 = vector.shape_cast %42 : vector<64xf32> to vector<1x64xf32>
    %44 = vector.broadcast %43 : vector<1x64xf32> to vector<16x64xf32>
    %45 = arith.addf %40, %44 : vector<16x64xf32>
    %cst_22 = arith.constant 5.000000e-01 : f32
    %46 = vector.broadcast %cst_22 : f32 to vector<16x64xf32>
    %47 = arith.mulf %46, %45 : vector<16x64xf32>
    %cst_23 = arith.constant 0.707106769 : f32
    %48 = vector.broadcast %cst_23 : f32 to vector<16x64xf32>
    %49 = arith.mulf %45, %48 : vector<16x64xf32>
    %50 = math.absf %49 : vector<16x64xf32>
    %cst_24 = arith.constant 0.327591091 : f32
    %51 = vector.broadcast %cst_24 : f32 to vector<16x64xf32>
    %52 = arith.mulf %51, %50 : vector<16x64xf32>
    %cst_25 = arith.constant 1.000000e+00 : f32
    %53 = vector.broadcast %cst_25 : f32 to vector<16x64xf32>
    %54 = arith.addf %53, %52 : vector<16x64xf32>
    %cst_26 = arith.constant 1.000000e+00 : f32
    %55 = vector.broadcast %cst_26 : f32 to vector<16x64xf32>
    %56 = arith.divf %55, %54 : vector<16x64xf32>
    %cst_27 = arith.constant 1.06140542 : f32
    %57 = vector.broadcast %cst_27 : f32 to vector<16x64xf32>
    %58 = arith.mulf %57, %56 : vector<16x64xf32>
    %cst_28 = arith.constant -1.45315206 : f32
    %59 = vector.broadcast %cst_28 : f32 to vector<16x64xf32>
    %60 = arith.addf %58, %59 : vector<16x64xf32>
    %61 = arith.mulf %60, %56 : vector<16x64xf32>
    %cst_29 = arith.constant 1.42141378 : f32
    %62 = vector.broadcast %cst_29 : f32 to vector<16x64xf32>
    %63 = arith.addf %61, %62 : vector<16x64xf32>
    %64 = arith.mulf %63, %56 : vector<16x64xf32>
    %cst_30 = arith.constant -0.284496725 : f32
    %65 = vector.broadcast %cst_30 : f32 to vector<16x64xf32>
    %66 = arith.addf %64, %65 : vector<16x64xf32>
    %67 = arith.mulf %66, %56 : vector<16x64xf32>
    %cst_31 = arith.constant 0.254829586 : f32
    %68 = vector.broadcast %cst_31 : f32 to vector<16x64xf32>
    %69 = arith.addf %67, %68 : vector<16x64xf32>
    %70 = arith.mulf %69, %56 : vector<16x64xf32>
    %cst_32 = arith.constant 0.000000e+00 : f32
    %71 = vector.broadcast %cst_32 : f32 to vector<16x64xf32>
    %72 = arith.subf %71, %50 : vector<16x64xf32>
    %73 = arith.mulf %72, %50 : vector<16x64xf32>
    %74 = math.exp %73 : vector<16x64xf32>
    %75 = arith.mulf %70, %74 : vector<16x64xf32>
    %cst_33 = arith.constant 1.000000e+00 : f32
    %76 = vector.broadcast %cst_33 : f32 to vector<16x64xf32>
    %77 = arith.subf %76, %75 : vector<16x64xf32>
    %cst_34 = arith.constant 0.000000e+00 : f32
    %78 = vector.broadcast %cst_34 : f32 to vector<16x64xf32>
    %79 = arith.cmpf oge, %49, %78 : vector<16x64xf32>
    %cst_35 = arith.constant 0.000000e+00 : f32
    %80 = vector.broadcast %cst_35 : f32 to vector<16x64xf32>
    %81 = arith.subf %80, %77 : vector<16x64xf32>
    %82 = arith.select %79, %77, %81 : vector<16x64xi1>, vector<16x64xf32>
    %cst_36 = arith.constant 1.000000e+00 : f32
    %83 = vector.broadcast %cst_36 : f32 to vector<16x64xf32>
    %84 = arith.addf %83, %82 : vector<16x64xf32>
    %85 = arith.mulf %47, %84 : vector<16x64xf32>
    %c0_37 = arith.constant 0 : index
    %c0_38 = arith.constant 0 : index
    %86 = vector.load %arg19[%c0_37, %c0_38] : memref<16x32xf32, #tpu.memory_space<vmem>>, vector<16x32xf32>
    %87 = arith.truncf %85 : vector<16x64xf32> to vector<16x64xbf16>
    %c0_39 = arith.constant 0 : index
    %c0_40 = arith.constant 0 : index
    %c0_41 = arith.constant 0 : index
    %88 = vector.load %arg13[%c0_39, %c0_40, %c0_41] : memref<1x64x32xbf16, #tpu.memory_space<vmem>>, vector<1x64x32xbf16>
    %89 = vector.shape_cast %88 : vector<1x64x32xbf16> to vector<64x32xbf16>
    %cst_42 = arith.constant dense<0.000000e+00> : vector<16x32xf32>
    %90 = tpu.matmul %87, %89, %cst_42 {dimension_numbers = #tpu.dot_dimension_numbers<[1], [0], [0], [1], [0, 0, 1, 1], [], []>} : vector<16x64xbf16>, vector<64x32xbf16>, vector<16x32xf32> -> vector<16x32xf32>
    %91 = arith.addf %86, %90 : vector<16x32xf32>
    %c0_43 = arith.constant 0 : index
    %c0_44 = arith.constant 0 : index
    %92 = vector.load %arg19[%c0_43, %c0_44] : memref<16x32xf32, #tpu.memory_space<vmem>>, vector<16x32xf32>
    tpu.vector_store %arg19[%c0_43, %c0_44], %91 {strides = array<i32>} : memref<16x32xf32, #tpu.memory_space<vmem>>, vector<16x32xf32>,
    %c0_i32_45 = arith.constant 0 : i32
    %93 = arith.cmpi eq, %arg2, %c0_i32_45 : i32
    %94 = arith.extui %93 : i1 to i32
    %c0_i32_46 = arith.constant 0 : i32
    %95 = arith.cmpi ne, %94, %c0_i32_46 : i32
    scf.if %95 {
      %c0_48 = arith.constant 0 : index
      %c0_49 = arith.constant 0 : index
      %100 = vector.load %arg19[%c0_48, %c0_49] : memref<16x32xf32, #tpu.memory_space<vmem>>, vector<16x32xf32>
      %c0_50 = arith.constant 0 : index
      %c0_51 = arith.constant 0 : index
      %c0_52 = arith.constant 0 : index
      %101 = vector.load %arg14[%c0_50, %c0_51, %c0_52] : memref<1x1x32xf32, #tpu.memory_space<vmem>>, vector<1x1x32xf32>
      %102 = vector.shape_cast %101 : vector<1x1x32xf32> to vector<32xf32>
      %103 = vector.shape_cast %102 : vector<32xf32> to vector<1x32xf32>
      %104 = vector.broadcast %103 : vector<1x32xf32> to vector<16x32xf32>
      %105 = arith.addf %100, %104 : vector<16x32xf32>
      %c0_53 = arith.constant 0 : index
      %c0_54 = arith.constant 0 : index
      %106 = vector.load %arg18[%c0_53, %c0_54] : memref<16x32xf32, #tpu.memory_space<vmem>>, vector<16x32xf32>
      %107 = arith.addf %105, %106 : vector<16x32xf32>
      %c0_55 = arith.constant 0 : index
      %c0_56 = arith.constant 0 : index
      %108 = vector.load %arg18[%c0_55, %c0_56] : memref<16x32xf32, #tpu.memory_space<vmem>>, vector<16x32xf32>
      tpu.vector_store %arg18[%c0_55, %c0_56], %107 {strides = array<i32>} : memref<16x32xf32, #tpu.memory_space<vmem>>, vector<16x32xf32>,
    } else {
    }
    %c1_i32 = arith.constant 1 : i32
    %96 = arith.cmpi eq, %arg1, %c1_i32 : i32
    %97 = arith.andi %93, %96 : i1
    %98 = arith.extui %97 : i1 to i32
    %c0_i32_47 = arith.constant 0 : i32
    %99 = arith.cmpi ne, %98, %c0_i32_47 : i32
    scf.if %99 {
      %c0_48 = arith.constant 0 : index
      %c0_49 = arith.constant 0 : index
      %100 = vector.load %arg18[%c0_48, %c0_49] : memref<16x32xf32, #tpu.memory_space<vmem>>, vector<16x32xf32>
      %c0_50 = arith.constant 0 : index
      %c0_51 = arith.constant 0 : index
      %101 = vector.load %arg15[%c0_50, %c0_51] : memref<1x32xf32, #tpu.memory_space<vmem>>, vector<1x32xf32>
      %102 = vector.shape_cast %101 : vector<1x32xf32> to vector<32xf32>
      %c0_52 = arith.constant 0 : index
      %c0_53 = arith.constant 0 : index
      %103 = vector.load %arg16[%c0_52, %c0_53] : memref<1x32xf32, #tpu.memory_space<vmem>>, vector<1x32xf32>
      %104 = vector.shape_cast %103 : vector<1x32xf32> to vector<32xf32>
      %cst_54 = arith.constant dense<0.000000e+00> : vector<16xf32>
      %105 = vector.multi_reduction <add>, %100, %cst_54 [1] : vector<16x32xf32> to vector<16xf32>
      %106 = vector.shape_cast %105 : vector<16xf32> to vector<16x1xf32>
      %cst_55 = arith.constant 3.200000e+01 : f32
      %107 = vector.broadcast %cst_55 : f32 to vector<16x1xf32>
      %108 = arith.divf %106, %107 : vector<16x1xf32>
      %109 = vector.broadcast %108 : vector<16x1xf32> to vector<16x32xf32>
      %110 = arith.subf %100, %109 : vector<16x32xf32>
      %111 = arith.mulf %110, %110 : vector<16x32xf32>
      %cst_56 = arith.constant dense<0.000000e+00> : vector<16xf32>
      %112 = vector.multi_reduction <add>, %111, %cst_56 [1] : vector<16x32xf32> to vector<16xf32>
      %113 = vector.shape_cast %112 : vector<16xf32> to vector<16x1xf32>
      %cst_57 = arith.constant 3.200000e+01 : f32
      %114 = vector.broadcast %cst_57 : f32 to vector<16x1xf32>
      %115 = arith.divf %113, %114 : vector<16x1xf32>
      %116 = vector.broadcast %108 : vector<16x1xf32> to vector<16x32xf32>
      %117 = arith.subf %100, %116 : vector<16x32xf32>
      %cst_58 = arith.constant 9.99999974E-6 : f32
      %118 = vector.broadcast %cst_58 : f32 to vector<16x1xf32>
      %119 = arith.addf %115, %118 : vector<16x1xf32>
      %120 = math.rsqrt %119 : vector<16x1xf32>
      %121 = vector.broadcast %120 : vector<16x1xf32> to vector<16x32xf32>
      %122 = arith.mulf %117, %121 : vector<16x32xf32>
      %123 = vector.shape_cast %102 : vector<32xf32> to vector<1x32xf32>
      %124 = vector.broadcast %123 : vector<1x32xf32> to vector<16x32xf32>
      %125 = arith.mulf %122, %124 : vector<16x32xf32>
      %126 = vector.shape_cast %104 : vector<32xf32> to vector<1x32xf32>
      %127 = vector.broadcast %126 : vector<1x32xf32> to vector<16x32xf32>
      %128 = arith.addf %125, %127 : vector<16x32xf32>
      %c0_59 = arith.constant 0 : index
      %c0_60 = arith.constant 0 : index
      %129 = vector.load %arg17[%c0_59, %c0_60] : memref<16x32xf32, #tpu.memory_space<vmem>>, vector<16x32xf32>
      tpu.vector_store %arg17[%c0_59, %c0_60], %128 {strides = array<i32>} : memref<16x32xf32, #tpu.memory_space<vmem>>, vector<16x32xf32>,
    } else {
    }
    return
  }
  func.func @transform_0(%arg0: i32, %arg1: i32, %arg2: i32) -> (i32, i32) {
    %c0_i32 = arith.constant 0 : i32
    %c0_i32_0 = arith.constant 0 : i32
    return %arg0, %c0_i32 : i32, i32
  }
  func.func @transform_1(%arg0: i32, %arg1: i32, %arg2: i32) -> (i32, i32, i32) {
    %c0_i32 = arith.constant 0 : i32
    %c0_i32_0 = arith.constant 0 : i32
    %c0_i32_1 = arith.constant 0 : i32
    return %arg1, %c0_i32, %c0_i32_0 : i32, i32, i32
  }
  func.func @transform_2(%arg0: i32, %arg1: i32, %arg2: i32) -> (i32, i32, i32) {
    %c0_i32 = arith.constant 0 : i32
    %c0_i32_0 = arith.constant 0 : i32
    %c0_i32_1 = arith.constant 0 : i32
    return %arg1, %c0_i32, %c0_i32_0 : i32, i32, i32
  }
  func.func @transform_3(%arg0: i32, %arg1: i32, %arg2: i32) -> (i32, i32, i32) {
    %c0_i32 = arith.constant 0 : i32
    %c0_i32_0 = arith.constant 0 : i32
    %c0_i32_1 = arith.constant 0 : i32
    return %arg1, %c0_i32, %c0_i32_0 : i32, i32, i32
  }
  func.func @transform_4(%arg0: i32, %arg1: i32, %arg2: i32) -> (i32, i32, i32) {
    %c0_i32 = arith.constant 0 : i32
    %c0_i32_0 = arith.constant 0 : i32
    %c0_i32_1 = arith.constant 0 : i32
    return %arg1, %c0_i32, %c0_i32_0 : i32, i32, i32
  }
  func.func @transform_5(%arg0: i32, %arg1: i32, %arg2: i32) -> (i32, i32, i32) {
    %c0_i32 = arith.constant 0 : i32
    %c0_i32_0 = arith.constant 0 : i32
    %c0_i32_1 = arith.constant 0 : i32
    return %arg1, %c0_i32, %c0_i32_0 : i32, i32, i32
  }
  func.func @transform_6(%arg0: i32, %arg1: i32, %arg2: i32) -> (i32, i32, i32) {
    %c0_i32 = arith.constant 0 : i32
    %c0_i32_0 = arith.constant 0 : i32
    %c0_i32_1 = arith.constant 0 : i32
    return %arg1, %c0_i32, %c0_i32_0 : i32, i32, i32
  }
  func.func @transform_7(%arg0: i32, %arg1: i32, %arg2: i32) -> (i32, i32, i32) {
    %c0_i32 = arith.constant 0 : i32
    %c0_i32_0 = arith.constant 0 : i32
    %c0_i32_1 = arith.constant 0 : i32
    return %arg1, %c0_i32, %c0_i32_0 : i32, i32, i32
  }
  func.func @transform_8(%arg0: i32, %arg1: i32, %arg2: i32) -> (i32, i32, i32) {
    %c0_i32 = arith.constant 0 : i32
    %c0_i32_0 = arith.constant 0 : i32
    return %arg1, %c0_i32, %arg2 : i32, i32, i32
  }
  func.func @transform_9(%arg0: i32, %arg1: i32, %arg2: i32) -> (i32, i32, i32) {
    %c0_i32 = arith.constant 0 : i32
    %c0_i32_0 = arith.constant 0 : i32
    return %arg1, %c0_i32, %arg2 : i32, i32, i32
  }
  func.func @transform_10(%arg0: i32, %arg1: i32, %arg2: i32) -> (i32, i32, i32) {
    %c0_i32 = arith.constant 0 : i32
    %c0_i32_0 = arith.constant 0 : i32
    return %arg1, %arg2, %c0_i32 : i32, i32, i32
  }
  func.func @transform_11(%arg0: i32, %arg1: i32, %arg2: i32) -> (i32, i32, i32) {
    %c0_i32 = arith.constant 0 : i32
    %c0_i32_0 = arith.constant 0 : i32
    %c0_i32_1 = arith.constant 0 : i32
    return %arg1, %c0_i32, %c0_i32_0 : i32, i32, i32
  }
  func.func @transform_12(%arg0: i32, %arg1: i32, %arg2: i32) -> (i32, i32) {
    %c0_i32 = arith.constant 0 : i32
    %c0_i32_0 = arith.constant 0 : i32
    %c0_i32_1 = arith.constant 0 : i32
    return %c0_i32, %c0_i32_0 : i32, i32
  }
  func.func @transform_13(%arg0: i32, %arg1: i32, %arg2: i32) -> (i32, i32) {
    %c0_i32 = arith.constant 0 : i32
    %c0_i32_0 = arith.constant 0 : i32
    %c0_i32_1 = arith.constant 0 : i32
    return %c0_i32, %c0_i32_0 : i32, i32
  }
  func.func @transform_14(%arg0: i32, %arg1: i32, %arg2: i32) -> (i32, i32) {
    %c0_i32 = arith.constant 0 : i32
    %c0_i32_0 = arith.constant 0 : i32
    return %arg0, %c0_i32 : i32, i32
  }
}

</mosaic_0001>

<bundles_post_ra>
// kernel: tpu_custom_call.1
= control target key start
LH: loop header
LB: loop body
LE: loop exit
PB: predicated region body
PF: predicated region fallthrough
CT: control target
= control target key end

     0   :  { %s4041_s0 = inlined_call_operand.vmem [shape: f32[32,32], index: 0, kind: input, shape index: {}]   ;;  %s4042_s1 = inlined_call_operand.vmem [shape: f32[2,1,32], index: 1, kind: input, shape index: {}]   ;;  %s4043_s2 = inlined_call_operand.vmem [shape: f32[2,1,32], index: 2, kind: input, shape index: {}]   ;;  %s4044_s3 = inlined_call_operand.vmem [shape: bf16[2,32,96], index: 3, kind: input, shape index: {}]   ;;  %s4045_s4 = inlined_call_operand.vmem [shape: bf16[2,32,32], index: 4, kind: input, shape index: {}]   ;;  %s4046_s5 = inlined_call_operand.hbm [shape: f32[2,1,32], index: 5, kind: input, shape index: {}]   ;;  %s4047_s6 = inlined_call_operand.hbm [shape: f32[2,1,32], index: 6, kind: input, shape index: {}]   ;;  %s4048_s7 = inlined_call_operand.hbm [shape: f32[2,1,32], index: 7, kind: input, shape index: {}]   ;;  %s4049_s8 = inlined_call_operand.hbm [shape: bf16[2,32,64], index: 8, kind: input, shape index: {}]   ;;  %s4050_s9 = inlined_call_operand.hbm [shape: f32[2,1,64], index: 9, kind: input, shape index: {}]   ;;  %s4051_s10 = inlined_call_operand.vmem [shape: bf16[2,64,32], index: 10, kind: input, shape index: {}]   ;;  %s4052_s11 = inlined_call_operand.vmem [shape: f32[2,1,32], index: 11, kind: input, shape index: {}]   ;;  %s4053_s12 = inlined_call_operand.vmem [shape: f32[1,32], index: 12, kind: input, shape index: {}]   ;;  %s4054_s13 = inlined_call_operand.vmem [shape: f32[1,32], index: 13, kind: input, shape index: {}]   ;;  %s4055_s14 = inlined_call_operand.hbm [shape: f32[32,32], index: 14, kind: output, shape index: {}]  }
   0x1   :  { %4073 = sst [smem:[#allocation29_spill]] %s4041_s0 }
   0x2   :  { %4074 = sst [smem:[#allocation30_spill]] %s4043_s2 }
   0x3   :  { %4075 = sst [smem:[#allocation31_spill]] %s4044_s3 }
   0x4   :  { %4076 = sst [smem:[#allocation32_spill]] %s4045_s4 }
   0x5   :  { %4077 = sst [smem:[#allocation33_spill]] %s4046_s5 }
   0x6   :  { %4078 = sst [smem:[#allocation34_spill]] %s4047_s6 }
   0x7   :  { %4079 = sst [smem:[#allocation35_spill]] %s4048_s7 }
   0x8   :  { %4080 = sst [smem:[#allocation36_spill]] %s4049_s8 }
   0x9   :  { %4081 = sst [smem:[#allocation37_spill]] %s4050_s9 }
   0xa   :  { %4082 = sst [smem:[#allocation38_spill]] %s4051_s10 }
   0xb   :  { %4083 = sst [smem:[#allocation39_spill]] %s4052_s11 }
   0xc   :  { %4084 = sst [smem:[#allocation40_spill]] %s4053_s12 }
   0xd   :  { %4085 = sst [smem:[#allocation41_spill]] %s4054_s13 }
   0xe   :  { %4086 = sst [smem:[#allocation42_spill]] %s4055_s14 }
   0xf   :  { %19 = vsyncpa [#allocation5], 0 }
  0x10   :  { %21 = vsyncpa [#allocation5 + $0x1], 0 }
  0x11   :  { %22 = vsyncpa [#allocation8], 0 }
  0x12   :  { %24 = vsyncpa [#allocation8 + $0x1], 0 }
  0x13   :  { %25 = vsyncpa [#allocation11], 0 }
  0x14   :  { %27 = vsyncpa [#allocation11 + $0x1], 0 }
  0x15   :  { %28 = vsyncpa [#allocation6], 0 }
  0x16   :  { %30 = vsyncpa [#allocation6 + $0x1], 0  ;;  %s3333_s29 = smov 0   ;;  %s3335_s30 = smov 0  }
  0x17   :  { %s3337_s15 = smov 0   ;;  %s3339_s16 = smov 0  }
  0x18   :  { %s3341_s17 = smov 0   ;;  %s3343_s18 = smov 0  }
  0x19   :  { %s3345_s19 = smov 0   ;;  %s3347_s20 = smov 0  }
  0x1a   :  { %s3349_s21 = smov 0   ;;  %s3351_s22 = smov 0  }
  0x1b   :  { %s3353_s23 = smov 0  }
  0x1c LB: > { %4087 = sst [smem:[#allocation18_spill]] %s3191_s29  ;;  %s3387_s24 = sadd.s32 4294967295, %s3231_s23   ;;  %s3231_s23 = sphi %s3353_s23, %s36_s23   ;;  %s3227_s22 = sphi %s3351_s22, %s4146_s22   ;;  %s3223_s21 = sphi %s3349_s21, %s4145_s21   ;;  %s3219_s20 = sphi %s3347_s20, %s4144_s20   ;;  %s3215_s19 = sphi %s3345_s19, %s4143_s19   ;;  %s3211_s18 = sphi %s3343_s18, %s4142_s18   ;;  %s3207_s17 = sphi %s3341_s17, %s4150_s17   ;;  %s3203_s16 = sphi %s3339_s16, %s4149_s16   ;;  %s3199_s15 = sphi %s3337_s15, %s4140_s15   ;;  %s3195_s30 = sphi %s3335_s30, %s4148_s30   ;;  %s3191_s29 = sphi %s3333_s29, %s4147_s29  }
  0x1d   : > { %4088 = sst [smem:[#allocation19_spill]] %s3199_s15  ;;  %s2481_s25 = sadd.s32 4294967294, %s3231_s23  }
  0x1e   : > { %4089 = sst [smem:[#allocation20_spill]] %s3211_s18  ;;  %s51_s26 = sadd.s32 1, %s3223_s21 }
  0x1f   : > { %4090 = sst [smem:[#allocation21_spill]] %s3223_s21  ;;  %s55_s27 = sadd.s32 1, %s3227_s22 }
  0x20   : > { %4091 = sst [smem:[#allocation22_spill]] %s3227_s22  ;;  %p53_p0 = scmp.ge.s32.totalorder %s51_s26, 2 }
  0x21   : > { %s192_s28 = sadd.s32 1, %s3211_s18  ;;  %p199_p1 = scmp.ne.s32.totalorder %s3211_s18, %s3207_s17 }
  0x22   : > { %p200_p2 = scmp.eq.s32.totalorder %s3231_s23, 0  ;;  %s4152_s26 = smov (%p53_p0, %s51_s26), 0 }
  0x23   : > { %4092 = sst [smem:[#allocation23_spill]] %s4152_s26  ;;  %s4154_s27 = smov (!%p53_p0, %s55_s27), %s3227_s22 }
  0x24   : > { %s189_s14 = ssub.s32 %s3223_s21, %s4152_s26  ;;  %p3401_p3 = por %p200_p2, %p199_p1 }
  0x25   : > { %p57_p4 = scmp.ge.s32.totalorder %s4154_s27, 2  ;;  %p190_p5 = scmp.eq.s32.totalorder %s189_s14, 0 }
  0x26   : > { %p205_p6 = scmp.ne.s32.totalorder %s3207_s17, %s3203_s16  ;;  %p206_p7 = scmp.eq.s32.totalorder %s3387_s24, 0 }
  0x27   : > { %s4156_s27 = smov (%p57_p4, %s4154_s27), 0  ;;  %s422_s11 = sadd.s32 1, %s3199_s15 }
  0x28   : > { %4094 = sst [smem:[#allocation24_spill]] %s4156_s27  ;;  %p3412_p8 = por %p206_p7, %p205_p6 }
  0x29   : > { %s3410_s12 = scalar_select %p190_p5, %s3211_s18, %s192_s28  }
  0x2a   : > { %s4096_s26 = scalar_select %p3412_p8, 1, 0 }
  0x2b   : > { %4095 = sst [smem:[#allocation25_spill]] %s3410_s12  ;;  %s419_s10 = ssub.s32 %s3227_s22, %s4156_s27 }
  0x2c   : > { %p420_p9 = scmp.eq.s32.totalorder %s419_s10, 0  ;;  %p432_p10 = scmp.ne.s32.totalorder %s3199_s15, %s3195_s30 }
  0x2d   : > { %p433_p11 = scmp.eq.s32.totalorder %s3387_s24, 3  ;;  %p438_p13 = scmp.ne.s32.totalorder %s3195_s30, %s3191_s29 }
  0x2e   : > { %s3423_s14 = scalar_select %p420_p9, %s3199_s15, %s422_s11  }
  0x2f   : > { %p3425_p12 = por %p433_p11, %p432_p10  ;;  %p439_p0 = scmp.eq.s32.totalorder %s2481_s25, 3 }
  0x30   : > { %4097 = sst [smem:[#allocation26_spill]] %s3423_s14  ;;  %p2765_p1 = scmp.lt.s32.totalorder %s3231_s23, 4 }
  0x31   : > { %s4098_s16 = scalar_select %p3425_p12, 1, 0 }
  0x32   : > { %s3433_s28 = sand.u32 1, %s3211_s18   ;;  %p3435_p2 = por %p439_p0, %p438_p13 }
  0x33   : > { %4099 = sst [smem:[#allocation27_spill]] %s4098_s16  ;;  %s3440_s10 = sshll.u32 %s3223_s21, 4 }
  0x34   : > { %s4100_s27 = scalar_select %p3435_p2, 1, 0 }
  0x35   : > { %p3444_p4 = pnand %p2765_p1, %p3401_p3  ;;  %s4066_s22 = sand.u32 1, %s3231_s23  }
  0x36   : > { %4101 = sst [smem:[#allocation28_spill]] %s4100_s27  ;;  %s4103_s6 = sld [smem:[#allocation34_spill]] }
  0x37   : > { %s4102_s11 = scalar_select %p3444_p4, 1, 0 }
  0x38   : > { %s522_s14 = scalar_lea.vmem [#allocation7], %s3433_s28  ;;  %s3461_s13 = scalar_lea.sflag [#allocation8], %s4066_s22 }
  0x39   : > { %s529_s15 = sshll.u32 %s522_s14, 4  ;;  %p3467_p6 = pneg %p3444_p4  ;;  %s3456_s15 = int_to_ptr.vmem [resolvable:$true] %s529_s15 }
  0x3c   : > { %s3453_s18 = scalar_lea.hbm %s4103_s6, %s3440_s10  ;;  %s2956_s14 = scalar_lea.hbm %s4103_s6, 32 }
  0x3d   : > { %s2951_s27 = scalar_lea.hbm %s3453_s18, 16  ;;  %p2957_p10 = scmp.lt.u32.totalorder %s3453_s18, %s4103_s6 }
  0x3e   : > { %p2952_p3 = scmp.ne.s32.totalorder %s3453_s18, %s2951_s27  ;;  %p2958_p11 = scmp.lt.u32.totalorder %s2956_s14, %s2951_s27 }
  0x3f   : > { %p2960_p0 = scmp.lt.u32.totalorder %s2951_s27, %s3453_s18 }
  0x40   : > { %p2954_p7 = pnand %p3467_p6, %p2952_p3  ;;  %p2959_p13 = por %p2958_p11, %p2957_p10 }
  0x42   : > { %p2955_p9 = pneg %p2954_p7  ;;  %p2961_p1 = por %p2960_p0, %p2959_p13 }
  0x44   : > { %p2962_p5 = pnand %p2961_p1, %p2955_p9 }
  0x46   : > { %2965 = shalt.err (!%p2962_p5)
}
  0x47   : > { %s2966_s22 = scalar_lea.vmem %s3456_s15, 16  ;;  %s3233_s12 = smov [#allocation7]  }
  0x48   : > { %p2967_p3 = scmp.ne.s32.totalorder %s3456_s15, %s2966_s22  ;;  %s2971_s25 = sshll.u32 %s3233_s12, 4  ;;  %s2972_s25 = int_to_ptr.vmem [resolvable:$false] %s2971_s25 }
  0x49   : > { %s2973_s4 = scalar_lea.vmem %s2972_s25, 32  ;;  %p2974_p12 = scmp.lt.s32.totalorder %s3456_s15, %s2972_s25 }
  0x4a   : > { %p2969_p7 = pnand %p2967_p3, %p3467_p6  ;;  %p2975_p8 = scmp.lt.s32.totalorder %s2973_s4, %s2966_s22 }
  0x4c   : > { %p2970_p2 = pneg %p2969_p7  ;;  %p2976_p10 = por %p2975_p8, %p2974_p12 }
  0x4e   : > { %p2977_p11 = pnand %p2976_p10, %p2970_p2 }
  0x50   : > { %2980 = shalt.err (!%p2977_p11)
}
  0x51   : > { %2751 = dma.hbm_to_vmem [thread:$0]  (!%p3444_p4), %s3453_s18, 16, %s3456_s15, %s3461_s13  }
  0x52   : > { %p610_p5 = scmp.lt.s32.totalorder %s3231_s23, 5  ;;  %s2487_s27 = sshll.u32 %s3433_s28, 4 }
  0x53   : > { %s2548_s16 = sshll.u32 %s3223_s21, 8  ;;  %p4105_p9 = scmp.ge.s32.totalorder %s3231_s23, 1 }
  0x54   : > { %s4107_s8 = sld [smem:[#allocation36_spill]]  ;;  %s557_s4 = scalar_lea.vmem [#allocation10], %s2487_s27 }
  0x55   : > { %p3496_p13 = pnand %p4105_p9, %p610_p5  ;;  %s565_s6 = sshll.u32 %s557_s4, 4  ;;  %s3505_s6 = int_to_ptr.vmem [resolvable:$true] %s565_s6 }
  0x56   : > { %s4108_s15 = sand.u32 1, %s3231_s23  }
  0x57   : > { %s4106_s22 = scalar_select %p3496_p13, 1, 0 }
  0x58   : > { %s3509_s18 = scalar_lea.sflag [#allocation11], %s4108_s15 }
  0x5a   : > { %s3503_s25 = scalar_lea.hbm %s4107_s8, %s2548_s16  ;;  %s2986_s16 = scalar_lea.hbm %s4107_s8, 512 }
  0x5b   : > { %s2981_s21 = scalar_lea.hbm %s3503_s25, 256  ;;  %p2987_p0 = scmp.lt.u32.totalorder %s3503_s25, %s4107_s8 }
  0x5c   : > { %p2982_p8 = scmp.ne.s32.totalorder %s3503_s25, %s2981_s21  ;;  %p2988_p1 = scmp.lt.u32.totalorder %s2986_s16, %s2981_s21 }
  0x5d   : > { %p2990_p7 = scmp.lt.u32.totalorder %s2981_s21, %s3503_s25 }
  0x5e   : > { %p2984_p12 = pnand %p2982_p8, %p3467_p6  ;;  %p2989_p3 = por %p2988_p1, %p2987_p0 }
  0x60   : > { %p2985_p2 = pneg %p2984_p12  ;;  %p2991_p10 = por %p2990_p7, %p2989_p3 }
  0x62   : > { %p2992_p11 = pnand %p2991_p10, %p2985_p2 }
  0x64   : > { %2995 = shalt.err (!%p2992_p11)
}
  0x65   : > { %s2996_s27 = scalar_lea.vmem %s3505_s6, 256  ;;  %s3234_s3 = smov [#allocation10]  }
  0x66   : > { %p2997_p5 = scmp.ne.s32.totalorder %s3505_s6, %s2996_s27  ;;  %s3001_s4 = sshll.u32 %s3234_s3, 4  ;;  %s3002_s4 = int_to_ptr.vmem [resolvable:$false] %s3001_s4 }
  0x67   : > { %s3003_s2 = scalar_lea.vmem %s3002_s4, 512  ;;  %p3004_p12 = scmp.lt.s32.totalorder %s3505_s6, %s3002_s4 }
  0x68   : > { %p2999_p9 = pnand %p2997_p5, %p3467_p6  ;;  %p3005_p13 = scmp.lt.s32.totalorder %s3003_s2, %s2996_s27 }
  0x6a   : > { %p3000_p8 = pneg %p2999_p9  ;;  %p3006_p0 = por %p3005_p13, %p3004_p12 }
  0x6c   : > { %p3007_p1 = pnand %p3006_p0, %p3000_p8 }
  0x6e   : > { %3010 = shalt.err (!%p3007_p1)
}
  0x6f   : > { %s3235_s21 = smov 64   ;;  %s3236_s15 = smov 4  }
  0x70   : > { %2757 = dma.hbm_to_vmem [thread:$0]  (!%p3444_p4), %s3503_s25, 256, %s3505_s6, %s3509_s18, %s3235_s21, %s3235_s21, %s3236_s15  }
  0x71   : > { %s4109_s5 = sld [smem:[#allocation33_spill]]  ;;  %s505_s27 = scalar_lea.vmem [#allocation4], %s3433_s28 }
  0x72   : > { %s512_s3 = sshll.u32 %s505_s27, 4  ;;  %s503_s4 = scalar_lea.sflag [#allocation5], %s3433_s28  ;;  %s513_s3 = int_to_ptr.vmem [resolvable:$true] %s512_s3 }
  0x77   : > { %s3537_s12 = scalar_lea.hbm %s4109_s5, %s3440_s10  ;;  %s3016_s25 = scalar_lea.hbm %s4109_s5, 32 }
  0x78   : > { %s3011_s2 = scalar_lea.hbm %s3537_s12, 16  ;;  %p3017_p7 = scmp.lt.u32.totalorder %s3537_s12, %s4109_s5 }
  0x79   : > { %p3012_p13 = scmp.ne.s32.totalorder %s3537_s12, %s3011_s2  ;;  %p3018_p10 = scmp.lt.u32.totalorder %s3016_s25, %s3011_s2 }
  0x7a   : > { %p3020_p5 = scmp.lt.u32.totalorder %s3011_s2, %s3537_s12 }
  0x7b   : > { %p3014_p2 = pnand %p3012_p13, %p3467_p6  ;;  %p3019_p11 = por %p3018_p10, %p3017_p7 }
  0x7d   : > { %p3015_p3 = pneg %p3014_p2  ;;  %p3021_p9 = por %p3020_p5, %p3019_p11 }
  0x7f   : > { %p3022_p8 = pnand %p3021_p9, %p3015_p3 }
  0x81   : > { %3025 = shalt.err (!%p3022_p8)
}
  0x82   : > { %s3026_s14 = scalar_lea.vmem %s513_s3, 16  ;;  %s3237_s16 = smov [#allocation4]  }
  0x83   : > { %p3027_p12 = scmp.ne.s32.totalorder %s513_s3, %s3026_s14  ;;  %s3031_s27 = sshll.u32 %s3237_s16, 4  ;;  %s3032_s27 = int_to_ptr.vmem [resolvable:$false] %s3031_s27 }
  0x84   : > { %s3033_s8 = scalar_lea.vmem %s3032_s27, 32  ;;  %p3034_p13 = scmp.lt.s32.totalorder %s513_s3, %s3032_s27 }
  0x85   : > { %p3029_p0 = pnand %p3027_p12, %p3467_p6  ;;  %p3035_p2 = scmp.lt.s32.totalorder %s3033_s8, %s3026_s14 }
  0x87   : > { %p3030_p1 = pneg %p3029_p0  ;;  %p3036_p4 = por %p3035_p2, %p3034_p13 }
  0x89   : > { %p3037_p7 = pnand %p3036_p4, %p3030_p1 }
  0x8b   : > { %3040 = shalt.err (!%p3037_p7)
}
  0x8c   : > { %p4110_p10 = scmp.ne.s32.totalorder %s4102_s11, 0  ;;  %s4111_s7 = sld [smem:[#allocation35_spill]] }
  0x8d   : > { %s539_s21 = scalar_lea.vmem [#allocation9], %s3433_s28 }
  0x8e   : > { %2748 = dma.hbm_to_vmem [thread:$0]  (!%p4110_p10), %s3537_s12, 16, %s513_s3, %s503_s4  }
  0x8f   : > { %s546_s15 = sshll.u32 %s539_s21, 4  ;;  %s547_s15 = int_to_ptr.vmem [resolvable:$true] %s546_s15 }
  0x92   : > { %s3562_s25 = scalar_lea.hbm %s4111_s7, %s3440_s10  ;;  %s3046_s12 = scalar_lea.hbm %s4111_s7, 32 }
  0x93   : > { %s3041_s14 = scalar_lea.hbm %s3562_s25, 16  ;;  %p3047_p5 = scmp.lt.u32.totalorder %s3562_s25, %s4111_s7 }
  0x94   : > { %p3042_p4 = scmp.ne.s32.totalorder %s3562_s25, %s3041_s14  ;;  %p3048_p9 = scmp.lt.u32.totalorder %s3046_s12, %s3041_s14 }
  0x95   : > { %p3050_p12 = scmp.lt.u32.totalorder %s3041_s14, %s3562_s25 }
  0x96   : > { %p3044_p3 = pnand %p3042_p4, %p3467_p6  ;;  %p3049_p8 = por %p3048_p9, %p3047_p5 }
  0x98   : > { %p3045_p11 = pneg %p3044_p3  ;;  %p3051_p0 = por %p3050_p12, %p3049_p8 }
  0x9a   : > { %p3052_p1 = pnand %p3051_p0, %p3045_p11 }
  0x9c   : > { %3055 = shalt.err (!%p3052_p1)
}
  0x9d   : > { %s3056_s8 = scalar_lea.vmem %s547_s15, 16  ;;  %s3238_s2 = smov [#allocation9]  }
  0x9e   : > { %p3057_p13 = scmp.ne.s32.totalorder %s547_s15, %s3056_s8  ;;  %s3061_s6 = sshll.u32 %s3238_s2, 4  ;;  %s3062_s6 = int_to_ptr.vmem [resolvable:$false] %s3061_s6 }
  0x9f   : > { %s3063_s21 = scalar_lea.vmem %s3062_s6, 32  ;;  %p3064_p4 = scmp.lt.s32.totalorder %s547_s15, %s3062_s6 }
  0xa0   : > { %p3059_p2 = pnand %p3057_p13, %p3467_p6  ;;  %p3065_p3 = scmp.lt.s32.totalorder %s3063_s21, %s3056_s8 }
  0xa2   : > { %p3060_p7 = pneg %p3059_p2  ;;  %p3066_p10 = por %p3065_p3, %p3064_p4 }
  0xa4   : > { %p3067_p5 = pnand %p3066_p10, %p3060_p7 }
  0xa6   : > { %3070 = shalt.err (!%p3067_p5)
}
  0xa7   : > { %p4112_p9 = scmp.ne.s32.totalorder %s4102_s11, 0  ;;  %s4113_s9 = sld [smem:[#allocation37_spill]] }
  0xa8   : > { %s578_s12 = scalar_lea.vmem [#allocation12], %s3433_s28 }
  0xa9   : > { %2754 = dma.hbm_to_vmem [thread:$0]  (!%p4112_p9), %s3562_s25, 16, %s547_s15, %s3461_s13  }
  0xaa   : > { %s586_s3 = sshll.u32 %s578_s12, 4  ;;  %s587_s3 = int_to_ptr.vmem [resolvable:$true] %s586_s3 }
  0xad   : > { %s3587_s27 = scalar_lea.hbm %s4113_s9, %s3440_s10  ;;  %s3076_s13 = scalar_lea.hbm %s4113_s9, 32 }
  0xae   : > { %s3071_s4 = scalar_lea.hbm %s3587_s27, 16  ;;  %p3077_p12 = scmp.lt.u32.totalorder %s3587_s27, %s4113_s9 }
  0xaf   : > { %p3072_p10 = scmp.ne.s32.totalorder %s3587_s27, %s3071_s4  ;;  %p3078_p0 = scmp.lt.u32.totalorder %s3076_s13, %s3071_s4 }
  0xb0   : > { %p3080_p13 = scmp.lt.u32.totalorder %s3071_s4, %s3587_s27 }
  0xb1   : > { %p3074_p11 = pnand %p3072_p10, %p3467_p6  ;;  %p3079_p1 = por %p3078_p0, %p3077_p12 }
  0xb3   : > { %p3075_p8 = pneg %p3074_p11  ;;  %p3081_p2 = por %p3080_p13, %p3079_p1 }
  0xb5   : > { %p3082_p7 = pnand %p3081_p2, %p3075_p8 }
  0xb7   : > { %3085 = shalt.err (!%p3082_p7)
}
  0xb8   : > { %s3086_s28 = scalar_lea.vmem %s587_s3, 16  ;;  %s3239_s10 = smov [#allocation12]  }
  0xb9   : > { %p3087_p4 = scmp.ne.s32.totalorder %s587_s3, %s3086_s28  ;;  %s3091_s6 = sshll.u32 %s3239_s10, 4  ;;  %s3092_s6 = int_to_ptr.vmem [resolvable:$false] %s3091_s6 }
  0xba   : > { %s3093_s21 = scalar_lea.vmem %s3092_s6, 32  ;;  %p3094_p10 = scmp.lt.s32.totalorder %s587_s3, %s3092_s6 }
  0xbb   : > { %p3089_p3 = pnand %p3087_p4, %p3467_p6  ;;  %p3095_p11 = scmp.lt.s32.totalorder %s3093_s21, %s3086_s28 }
  0xbd   : > { %p3090_p5 = pneg %p3089_p3  ;;  %p3096_p9 = por %p3095_p11, %p3094_p10 }
  0xbf   : > { %p3097_p0 = pnand %p3096_p9, %p3090_p5 }
  0xc1   : > { %3100 = shalt.err (!%p3097_p0)
}
  0xc2   : > { %p4114_p12 = scmp.ne.s32.totalorder %s4102_s11, 0  ;;  %p4115_p8 = scmp.ne.s32.totalorder %s4106_s22, 0 }
  0xc3   : > { %s3611_s29 = sand.u32 (!%p4115_p8), 1, %s3207_s17   ;;  %p4116_p6 = scmp.ne.s32.totalorder (!%p4115_p8), %s4096_s26, 0 }
  0xc4   : > { %2760 = dma.hbm_to_vmem [thread:$0]  (!%p4114_p12), %s3587_s27, 16, %s587_s3, %s3509_s18  }
  0xc5   : > { %614 = sbr.rel (%p4115_p8) target bundleno = 3259 (0xcbb), region = 76  ;;  %s617_s14 = scalar_lea.sflag (!%p4115_p8), [#allocation5], %s3611_s29 }
  0xcc   : > { %3174 = dma.done.wait (%p4116_p6), %s617_s14, 16  }
  0xcd   : > { %3176 = vsyncadd (%p4116_p6), %s617_s14, 4294967280  ;;  %s624_s11 = sand.u32 1, %s3387_s24  }
  0xce   : > { %s625_s18 = scalar_lea.sflag [#allocation8], %s624_s11 }
  0xcf   : > { %3178 = dma.done.wait (%p4116_p6), %s625_s18, 32  }
  0xd0   : > { %3180 = vsyncadd (%p4116_p6), %s625_s18, 4294967264  ;;  %s2492_s27 = sshll.u32 %s3611_s29, 4  ;;  %s641_s3 = scalar_lea.sflag [#allocation11], %s624_s11 }
  0xd1   : > { %s3627_s4 = scalar_lea.vmem [#allocation10], %s2492_s27 }
  0xd2   : > { %3182 = dma.done.wait (%p4116_p6), %s641_s3, 272  }
  0xd3   : > { %3184 = vsyncadd (%p4116_p6), %s641_s3, 4294967024  ;;  %s4072_s24 = sand.u32 1, %s3195_s30   ;;  %s2494_s2 = sshll.u32 %s3219_s20, 1 }
  0xd4   : > { %s2493_s8 = sshll.u32 %s4072_s24, 4  ;;  %p747_p9 = scmp.lt.s32.totalorder %s2494_s2, 3 }
  0xd5   : > { %p752_p1 = scmp.lt.s32.totalorder %s3215_s19, 1  ;;  %p783_p13 = scmp.eq.s32.totalorder %s3215_s19, 0 }
  0xd6   : > { %s4158_s2 = smov (!%p747_p9, %s2494_s2), 3  ;;  %s4117_s0 = sld [smem:[#allocation29_spill]]  ;;  %vm791_vm0 = vcmask (%p783_p13), 261120  }
  0xd7   : > { %s3640_s13 = scalar_select %p752_p1, %s3215_s19, 1 }
  0xd8   : > { %s2495_s26 = sshll.u32 %s4158_s2, 3  ;;  %s4119_s22 = sld [smem:[#allocation31_spill]] }
  0xd9   : > { %s2549_s3 = sshll.u32 %s3640_s13, 4  ;;  %s4120_s7 = sld [smem:[#allocation32_spill]] }
  0xda   : > { %s4121_s10 = sld [smem:[#allocation39_spill]]  ;;  %s4122_s14 = sld [smem:[#allocation38_spill]] }
  0xdb   : > { %s652_s18 = scalar_lea.vmem [#allocation12], %s3611_s29  ;;  %s3675_s27 = scalar_lea.vmem [#allocation13], %s2493_s8 }
  0xdc   : > { %s750_s28 = scalar_lea.vmem %s4117_s0, %s2495_s26  ;;  %s2551_s26 = sshll.u32 %s3640_s13, 5 }
  0xdd   : > { %788 = sbr.rel (!%p783_p13) target bundleno = 228 (0xe4), region = 100  ;;  %v789_v0 = vld [vmem:[%s750_s28] sm:$0xff] (%p783_p13)  ;;  %v790_v1 = vld [vmem:[%s750_s28 + $0x8] sm:$0xff] (%p783_p13) }
  0xde   : > { %s3657_s16 = scalar_lea.vmem %s4119_s22, %s2549_s3  ;;  %792 = vst.msk [vmem:[#allocation2] sm:$0xff] (%p783_p13), %vm791_vm0, %v789_v0  ;;  %793 = vst.msk [vmem:[#allocation2 + $0x8] sm:$0xff] (%p783_p13), %vm791_vm0, %v790_v1 }
  0xdf   : > { %s3662_s9 = scalar_lea.vmem %s4120_s7, %s2549_s3 }
  0xe0   : > { %s780_s6 = scalar_lea.vmem %s4121_s10, %s3640_s13  ;;  %s3672_s11 = scalar_lea.vmem %s4122_s14, %s2551_s26 }
  0xe4 PF: > { %vm801_vm1 = vcmask 261120   ;;  %v2889_v16 = vld [vmem:[%s3657_s16] sm:$0xff]   ;;  %v3240_v17 = vmov 0.0   ;;  %v2890_v18 = vld [vmem:[%s3657_s16 + $0x8] sm:$0xff]   ;;  %vm3241_vm2 = vmmov 0   ;;  %s4123_s7 = scalar_lea.vmem %s4042_s1, %s3640_s13  ;;  %s4124_s12 = sld [smem:[#allocation30_spill]] }
  0xe5   : > { %v3679_v2 = vld [vmem:[#allocation2] sm:$0xff]  ;;  %v3681_v3 = vld [vmem:[#allocation2 + $0x8] sm:$0xff]  ;;  %2601 = vmatprep.subr.bf16.mxu0 %v3240_v17  ;;  %1892 = vst.msk [vmem:[#allocation3] sm:$0xff] %vm801_vm1, %v3240_v17  ;;  %1893 = vst.msk [vmem:[#allocation3 + $0x8] sm:$0xff] %vm801_vm1, %v3240_v17  ;;  %2609 = vmatprep.subr.bf16.mxu1 %v3240_v17  ;;  %s3242_s8 = smov 88   ;;  %s3243_s28 = smov 96  }
  0xe6   : > { %v802_v4 = vsel %vm801_vm1, %v3679_v2, 0.0  ;;  %v805_v5 = vsel %vm801_vm1, %v3681_v3, 0.0  ;;  %2602 = vmatpush3.bf16.msra.mxu0 %v2889_v16  ;;  %2605 = vmatprep.mubr.msk.bf16.mxu0 %vm3241_vm2, %v3240_v17  ;;  %v2503_v27 = vld [vmem:[%s4123_s7] ss:$0 sm:$0xff]  ;;  %s3244_s21 = smov 120   ;;  %s3245_s3 = smov 112  }
  0xe7   : > { %803 = vadd.xlane.f32.xlu0 %v802_v4  ;;  %2603 = vmatprep.subr.bf16.mxu0 %v3240_v17  ;;  %s3246_s2 = smov 80   ;;  %s3247_s26 = smov 104   ;;  %vm910_vm3 = vcmask 64512   ;;  %vm974_vm4 = vcmask 1043456   ;;  %vm1361_vm5 = vcmask 130048   ;;  %vm1363_vm6 = vcmask 195584  }
  0xe8   : > { %2611 = vmatprep.mubr.msk.bf16.mxu1 %vm3241_vm2, %v3240_v17  ;;  %s3248_s25 = smov 72   ;;  %s3249_s15 = smov 56   ;;  %vm2099_vm9 = vcmask 523264  }
  0xe9   : > { %s3250_s10 = smov 64   ;;  %s3251_s14 = smov 48  }
  0xea   : > { %2604 = vmatpush3.bf16.msra.mxu0 %v2890_v18  ;;  %s4125_s24 = scalar_lea.vmem %s4124_s12, %s3640_s13  ;;  %s3252_s0 = smov 40  }
  0xeb   : > { %806 = vadd.xlane.f32.xlu0 %v805_v5  ;;  %2615 = vmatprep.subr.bf16.mxu0 %v3240_v17  ;;  %v2504_v31 = vld [vmem:[%s4125_s24] ss:$0 sm:$0xff]  ;;  %s3253_s5 = smov 8   ;;  %s3254_s7 = smov 16  }
  0xec   : > { %s3255_s16 = smov 24   ;;  %s4127_s22 = scalar_lea.vmem [#allocation7], %s3611_s29 }
  0xed   : > { %p2168_p2 = scmp.eq.s32.totalorder %s3215_s19, 1 }
 0x174   : > { %v804_v6 = vpop.xlane.xlu0 %803 }
 0x175   : > { %v809_v7 = vmul.f32 0.03125, %v804_v6 }
 0x177   : > { %v811_v8 = vsub.f32 %v3679_v2, %v809_v7 }
 0x178   : > { %v807_v9 = vpop.xlane.xlu0 %806 }
 0x179   : > { %v810_v10 = vmul.f32 0.03125, %v807_v9  ;;  %v813_v11 = vmul.f32 %v811_v8, %v811_v8 }
 0x17b   : > { %v812_v12 = vsub.f32 %v3681_v3, %v810_v10  ;;  %v815_v13 = vsel %vm801_vm1, %v813_v11, 0.0 }
 0x17c   : > { %816 = vadd.xlane.f32.xlu1 %v815_v13 }
 0x17d   : > { %v814_v14 = vmul.f32 %v812_v12, %v812_v12 }
 0x17f   : > { %v818_v15 = vsel %vm801_vm1, %v814_v14, 0.0 }
 0x180   : > { %819 = vadd.xlane.f32.xlu1 %v818_v15 }
 0x209   : > { %v817_v19 = vpop.xlane.xlu1 %816 }
 0x20a   : > { %v821_v20 = vmul.f32 0.03125, %v817_v19 }
 0x20c   : > { %v823_v21 = vadd.f32 1e-05, %v821_v20 }
 0x20d   : > { %v820_v22 = vpop.xlane.xlu1 %819 }
 0x20e   : > { %2899 = vrsqrt.f32 %v823_v21  ;;  %v822_v23 = vmul.f32 0.03125, %v820_v22 }
 0x210   : > { %v824_v24 = vadd.f32 1e-05, %v822_v23 }
 0x212   : > { %2901 = vrsqrt.f32 %v824_v24 }
 0x218   : > { %v2900_v25 = vpop.eup %2899 }
 0x219   : > { %v827_v26 = vmul.f32 %v2900_v25, %v811_v8 }
 0x21b   : > { %v835_v30 = vmul.f32 %v2503_v27, %v827_v26 }
 0x21c   : > { %v2902_v28 = vpop.eup %2901 }
 0x21d   : > { %v828_v29 = vmul.f32 %v2902_v28, %v812_v12  ;;  %v843_v33 = vadd.f32 %v2504_v31, %v835_v30 }
 0x21f   : > { %v836_v32 = vmul.f32 %v2503_v27, %v828_v29 }
 0x221   : > { %v844_v34 = vadd.f32 %v2504_v31, %v836_v32 }
 0x223   : > { %v845_v35 = vpack.c.bf16 %v844_v34, %v843_v33 }
 0x225   : > { %2606 = vmatmul.mubr.msk.bf16.vlgmr.msra.gmra.mrb[0].mxu0 %vm801_vm1, %v845_v35 }
 0x226   : > { %2617 = vmatprep.mubr.msk.bf16.mxu0 %vm3241_vm2, %v3240_v17 }
 0x2f8   : > { %v899_v36 = vpop.f32.mrb[0].mxu0 }
 0x2f9   : > { %v3718_v37 = vpack.c.bf16 %v899_v36, %v899_v36  ;;  %v2607_v38 = vpop.f32.mrb[1].mxu0 }
 0x2fa   : > { %v902_v39 = vpop.f32.mrb[2].mxu0 }
 0x2fb   : > { %1020 = vrot.lane.b32.xlu1 %v3718_v37, %s3242_s8  ;;  %908 = vrot.lane.b32.xlu0 %v3718_v37, %s3243_s28  ;;  %v2608_v40 = vpop.f32.mrb[3].mxu0  ;;  %v3726_v41 = vpack.c.bf16 %v902_v39, %v902_v39 }
 0x2ff   : > { %1018 = vrot.lane.b32.xlu1 %v3718_v37, %s3244_s21  ;;  %1128 = vrot.lane.b32.xlu0 %v3718_v37, %s3245_s3 }
 0x303   : > { %1130 = vrot.lane.b32.xlu1 %v3718_v37, %s3246_s2  ;;  %1238 = vrot.lane.b32.xlu0 %v3718_v37, %s3247_s26 }
 0x307   : > { %1240 = vrot.lane.b32.xlu1 %v3718_v37, %s3248_s25  ;;  %1477 = vrot.lane.b32.xlu0 %v3726_v41, %s3242_s8  ;;  %s4131_s8 = sld [smem:[#allocation41_spill]] (%p2168_p2) }
 0x30b   : > { %1587 = vrot.lane.b32.xlu0 %v3726_v41, %s3246_s2  ;;  %1367 = vrot.lane.b32.xlu1 %v3726_v41, %s3243_s28 }
 0x30f   : > { %1697 = vrot.lane.b32.xlu0 %v3726_v41, %s3248_s25  ;;  %1475 = vrot.lane.b32.xlu1 %v3726_v41, %s3244_s21 }
 0x313   : > { %1585 = vrot.lane.b32.xlu1 %v3726_v41, %s3245_s3 }
 0x317   : > { %1695 = vrot.lane.b32.xlu1 %v3726_v41, %s3247_s26 }
 0x31b   : > { %1080 = vrot.lane.b32.xlu1 %v3718_v37, %s3249_s15 }
 0x36d   : > { %v909_v42 = vpop.permute.xlu0 %908  ;;  %v1021_v44 = vpop.permute.xlu1 %1020 }
 0x36e   : > { %v915_v43 = vsel %vm910_vm3, %v909_v42, 0  ;;  %v1026_v46 = vsel %vm910_vm3, %v1021_v44, 0 }
 0x36f   : > { %2610 = vmatpush3.bf16.xpose.msra.mxu1 %v915_v43 }
 0x370   : > { %2621 = vmatprep.subr.bf16.mxu1 %v3240_v17 }
 0x371   : > { %v1019_v45 = vpop.permute.xlu1 %1018  ;;  %v1129_v50 = vpop.permute.xlu0 %1128 }
 0x375   : > { %v1131_v47 = vpop.permute.xlu1 %1130  ;;  %v1239_v53 = vpop.permute.xlu0 %1238 }
 0x376   : > { %2612 = vmatmul.mubr.msk.bf16.vlgmr.msra.gmra.mrb[0].mxu1 %vm910_vm3, %v3718_v37  ;;  %v1136_v48 = vsel %vm910_vm3, %v1131_v47, 0 }
 0x377   : > { %2622 = vmatpush3.bf16.xpose.msra.mxu1 %v1026_v46  ;;  %2623 = vmatprep.mubr.msk.bf16.mxu1 %vm3241_vm2, %v3240_v17 }
 0x378   : > { %2633 = vmatprep.subr.bf16.mxu1 %v3240_v17 }
 0x379   : > { %v1241_v49 = vpop.permute.xlu1 %1240  ;;  %v1478_v55 = vpop.permute.xlu0 %1477 }
 0x37a   : > { %v1246_v51 = vsel %vm910_vm3, %v1241_v49, 0  ;;  %v1483_v56 = vsel %vm910_vm3, %v1478_v55, 0 }
 0x37d   : > { %v1368_v52 = vpop.permute.xlu1 %1367  ;;  %v1588_v57 = vpop.permute.xlu0 %1587 }
 0x37e   : > { %2624 = vmatmul.mubr.msk.bf16.vlgmr.msra.gmra.mrb[4].mxu1 %vm910_vm3, %v1019_v45  ;;  %v1373_v54 = vsel %vm910_vm3, %v1368_v52, 0  ;;  %v1593_v59 = vsel %vm910_vm3, %v1588_v57, 0 }
 0x37f   : > { %2634 = vmatpush3.bf16.xpose.msra.mxu1 %v1136_v48  ;;  %2635 = vmatprep.mubr.msk.bf16.mxu1 %vm3241_vm2, %v3240_v17 }
 0x380   : > { %2645 = vmatprep.subr.bf16.mxu1 %v3240_v17 }
 0x381   : > { %v1476_v58 = vpop.permute.xlu1 %1475  ;;  %v1698_v60 = vpop.permute.xlu0 %1697 }
 0x382   : > { %v1703_v62 = vsel %vm910_vm3, %v1698_v60, 0 }
 0x385   : > { %v1586_v61 = vpop.permute.xlu1 %1585 }
 0x386   : > { %2636 = vmatmul.mubr.msk.bf16.vlgmr.msra.gmra.mrb[8].mxu1 %vm910_vm3, %v1129_v50 }
 0x387   : > { %2646 = vmatpush3.bf16.xpose.msra.mxu1 %v1246_v51  ;;  %2647 = vmatprep.mubr.msk.bf16.mxu1 %vm3241_vm2, %v3240_v17 }
 0x388   : > { %2657 = vmatprep.subr.bf16.mxu1 %v3240_v17 }
 0x389   : > { %v1696_v63 = vpop.permute.xlu1 %1695 }
 0x38d   : > { %v3807_v48 = vpop.permute.xlu1 %1080 }
 0x38e   : > { %2648 = vmatmul.mubr.msk.bf16.vlgmr.msra.gmra.mrb[12].mxu1 %vm910_vm3, %v1239_v53 }
 0x38f   : > { %2658 = vmatpush3.bf16.xpose.msra.mxu1 %v1373_v54  ;;  %2659 = vmatprep.mubr.msk.bf16.mxu1 %vm3241_vm2, %v3240_v17 }
 0x390   : > { %2669 = vmatprep.subr.bf16.mxu1 %v3240_v17 }
 0x396   : > { %2660 = vmatmul.mubr.msk.bf16.vlgmr.msra.gmra.mrb[16].mxu1 %vm910_vm3, %v3726_v41 }
 0x397   : > { %2670 = vmatpush3.bf16.xpose.msra.mxu1 %v1483_v56  ;;  %2671 = vmatprep.mubr.msk.bf16.mxu1 %vm3241_vm2, %v3240_v17 }
 0x398   : > { %2681 = vmatprep.subr.bf16.mxu1 %v3240_v17 }
 0x39e   : > { %2672 = vmatmul.mubr.msk.bf16.vlgmr.msra.gmra.mrb[20].mxu1 %vm910_vm3, %v1476_v58 }
 0x39f   : > { %2682 = vmatpush3.bf16.xpose.msra.mxu1 %v1593_v59  ;;  %2683 = vmatprep.mubr.msk.bf16.mxu1 %vm3241_vm2, %v3240_v17 }
 0x3a0   : > { %2693 = vmatprep.subr.bf16.mxu1 %v3240_v17 }
 0x3a6   : > { %2684 = vmatmul.mubr.msk.bf16.vlgmr.msra.gmra.mrb[24].mxu1 %vm910_vm3, %v1586_v61 }
 0x3a7   : > { %2694 = vmatpush3.bf16.xpose.msra.mxu1 %v1703_v62  ;;  %2695 = vmatprep.mubr.msk.bf16.mxu1 %vm3241_vm2, %v3240_v17 }
 0x3a8   : > { %2705 = vmatprep.subr.bf16.mxu1 %v3240_v17 }
 0x3ae   : > { %2696 = vmatmul.mubr.msk.bf16.vlgmr.msra.gmra.mrb[28].mxu1 %vm910_vm3, %v1696_v63 }
 0x3af   : > { %2709 = vmatprep.mubr.msk.bf16.mxu1 %vm3241_vm2, %v3240_v17 }
 0x449   : > { %v951_v0 = vpop.f32.mrb[0].mxu1 }
 0x44a   : > { %v2613_v1 = vpop.f32.mrb[1].mxu1  ;;  %v957_v4 = vsel %vm910_vm3, %v951_v0, -inf }
 0x44b   : > { %v954_v5 = vpop.f32.mrb[2].mxu1  ;;  %958 = vmax.xlane.f32.xlu0 %v957_v4 }
 0x44c   : > { %v2614_v6 = vpop.f32.mrb[3].mxu1 }
 0x451   : > { %v1062_v7 = vpop.f32.mrb[4].mxu1 }
 0x452   : > { %v2625_v8 = vpop.f32.mrb[5].mxu1  ;;  %v1068_v9 = vsel %vm910_vm3, %v1062_v7, -inf }
 0x453   : > { %v1065_v10 = vpop.f32.mrb[6].mxu1  ;;  %1069 = vmax.xlane.f32.xlu1 %v1068_v9 }
 0x454   : > { %v2626_v11 = vpop.f32.mrb[7].mxu1 }
 0x459   : > { %v3782_v12 = vpop.f32.mrb[8].mxu1 }
 0x45a   : > { %v2637_v13 = vpop.f32.mrb[9].mxu1  ;;  %v1178_v34 = vsel %vm910_vm3, %v3782_v12, -inf }
 0x45b   : > { %v1175_v14 = vpop.f32.mrb[10].mxu1 }
 0x45c   : > { %v2638_v15 = vpop.f32.mrb[11].mxu1 }
 0x461   : > { %v3784_v16 = vpop.f32.mrb[12].mxu1  ;;  %969 = vrot.lane.b32.xlu0 %v3718_v37, %s3250_s10 }
 0x462   : > { %v2649_v18 = vpop.f32.mrb[13].mxu1  ;;  %v1288_v40 = vsel %vm910_vm3, %v3784_v16, -inf }
 0x463   : > { %v1285_v19 = vpop.f32.mrb[14].mxu1 }
 0x464   : > { %v2650_v20 = vpop.f32.mrb[15].mxu1 }
 0x469   : > { %v3788_v21 = vpop.f32.mrb[16].mxu1 }
 0x46a   : > { %v2661_v22 = vpop.f32.mrb[17].mxu1  ;;  %v1415_v43 = vsel %vm910_vm3, %v3788_v21, -inf }
 0x46b   : > { %v1412_v23 = vpop.f32.mrb[18].mxu1 }
 0x46c   : > { %v2662_v24 = vpop.f32.mrb[19].mxu1 }
 0x471   : > { %v1519_v25 = vpop.f32.mrb[20].mxu1 }
 0x472   : > { %v2673_v26 = vpop.f32.mrb[21].mxu1  ;;  %v1525_v27 = vsel %vm910_vm3, %v1519_v25, -inf }
 0x473   : > { %1526 = vmax.xlane.f32.xlu1 %v1525_v27  ;;  %v1522_v28 = vpop.f32.mrb[22].mxu1 }
 0x474   : > { %v2674_v29 = vpop.f32.mrb[23].mxu1 }
 0x479   : > { %v3791_v30 = vpop.f32.mrb[24].mxu1 }
 0x47a   : > { %v2685_v31 = vpop.f32.mrb[25].mxu1  ;;  %v1635_v44 = vsel %vm910_vm3, %v3791_v30, -inf }
 0x47b   : > { %v1632_v32 = vpop.f32.mrb[26].mxu1 }
 0x47c   : > { %v2686_v33 = vpop.f32.mrb[27].mxu1  ;;  %v1086_v32 = vsel %vm974_vm4, %v3807_v48, 0 }
 0x480   : > { %1179 = vmax.xlane.f32.xlu0 %v1178_v34 }
 0x481   : > { %v3795_v35 = vpop.f32.mrb[28].mxu1 }
 0x482   : > { %v2697_v36 = vpop.f32.mrb[29].mxu1  ;;  %v1745_v38 = vsel %vm910_vm3, %v3795_v35, -inf }
 0x483   : > { %1746 = vmax.xlane.f32.xlu1 %v1745_v38  ;;  %v1742_v39 = vpop.f32.mrb[30].mxu1 }
 0x484   : > { %1289 = vmax.xlane.f32.xlu0 %v1288_v40  ;;  %v2698_v42 = vpop.f32.mrb[31].mxu1 }
 0x488   : > { %1416 = vmax.xlane.f32.xlu0 %v1415_v43 }
 0x48c   : > { %1636 = vmax.xlane.f32.xlu0 %v1635_v44 }
 0x4a2   : > { %1190 = vrot.lane.b32.xlu0 %v3718_v37, %s3251_s14 }
 0x4d8   : > { %v959_v45 = vpop.xlane.xlu0 %958 }
 0x4d9   : > { %v960_v46 = vsub.f32 %v951_v0, %v959_v45 }
 0x4db   : > { %v961_v47 = vmul.f32 1.442695, %v960_v46 }
 0x4dc   : > { %v970_v49 = vpop.permute.xlu0 %969 }
 0x4dd   : > { %2903 = vpow2.f32 %v961_v47  ;;  %v976_v50 = vsel %vm974_vm4, %v970_v49, 0 }
 0x4de   : > { %2616 = vmatpush3.bf16.msra.mxu0 %v976_v50 }
 0x4df   : > { %2627 = vmatprep.subr.bf16.mxu0 %v3240_v17 }
 0x4e0   : > { %v1070_v51 = vpop.xlane.xlu1 %1069 }
 0x4e1   : > { %v1071_v52 = vsub.f32 %v1062_v7, %v1070_v51 }
 0x4e3   : > { %v1072_v53 = vmul.f32 1.442695, %v1071_v52 }
 0x4e5   : > { %2905 = vpow2.f32 %v1072_v53 }
 0x4e7   : > { %v2904_v54 = vpop.eup %2903 }
 0x4e8   : > { %v963_v55 = vsel %vm910_vm3, %v2904_v54, 0.0 }
 0x4e9   : > { %964 = vadd.xlane.f32.xlu0 %v963_v55 }
 0x4ef   : > { %v3812_v56 = vpop.eup %2905 }
 0x4f0   : > { %v1074_v57 = vsel %vm910_vm3, %v3812_v56, 0.0 }
 0x4f1   : > { %1075 = vadd.xlane.f32.xlu1 %v1074_v57 }
 0x500   : > { %v1527_v0 = vpop.xlane.xlu1 %1526 }
 0x501   : > { %v1528_v5 = vsub.f32 %v1519_v25, %v1527_v0 }
 0x502   : > { %1427 = vrot.lane.b32.xlu1 %v3726_v41, %s3250_s10 }
 0x503   : > { %v1529_v8 = vmul.f32 1.442695, %v1528_v5 }
 0x50d   : > { %v1180_v58 = vpop.xlane.xlu0 %1179 }
 0x50e   : > { %v1181_v59 = vsub.f32 %v3782_v12, %v1180_v58 }
 0x510   : > { %v1182_v60 = vmul.f32 1.442695, %v1181_v59  ;;  %v1747_v20 = vpop.xlane.xlu1 %1746 }
 0x511   : > { %v1290_v61 = vpop.xlane.xlu0 %1289 }
 0x512   : > { %2907 = vpow2.f32 %v1182_v60  ;;  %v1291_v62 = vsub.f32 %v3784_v16, %v1290_v61 }
 0x514   : > { %v1292_v63 = vmul.f32 1.442695, %v1291_v62 }
 0x515   : > { %v1417_v1 = vpop.xlane.xlu0 %1416 }
 0x516   : > { %v1418_v4 = vsub.f32 %v3788_v21, %v1417_v1  ;;  %2909 = vpow2.f32 %v1292_v63  ;;  %v1748_v21 = vsub.f32 %v3795_v35, %v1747_v20 }
 0x518   : > { %v1419_v6 = vmul.f32 1.442695, %v1418_v4  ;;  %v1749_v23 = vmul.f32 1.442695, %v1748_v21 }
 0x519   : > { %v1637_v16 = vpop.xlane.xlu0 %1636 }
 0x51a   : > { %2911 = vpow2.f32 %v1419_v6  ;;  %v1638_v18 = vsub.f32 %v3791_v30, %v1637_v16 }
 0x51b   : > { %2913 = vpow2.f32 %v1529_v8 }
 0x51c   : > { %v2908_v7 = vpop.eup %2907  ;;  %v1639_v19 = vmul.f32 1.442695, %v1638_v18 }
 0x51d   : > { %v1184_v9 = vsel %vm910_vm3, %v2908_v7, 0.0  ;;  %v1191_v26 = vpop.permute.xlu0 %1190 }
 0x51e   : > { %1185 = vadd.xlane.f32.xlu0 %v1184_v9  ;;  %2915 = vpow2.f32 %v1639_v19  ;;  %v1196_v35 = vsel %vm974_vm4, %v1191_v26, 0 }
 0x51f   : > { %2917 = vpow2.f32 %v1749_v23 }
 0x520   : > { %v3822_v10 = vpop.eup %2909 }
 0x521   : > { %v1294_v11 = vsel %vm910_vm3, %v3822_v10, 0.0 }
 0x524   : > { %v3826_v12 = vpop.eup %2911 }
 0x525   : > { %v1421_v13 = vsel %vm910_vm3, %v3826_v12, 0.0  ;;  %v3830_v14 = vpop.eup %2913 }
 0x526   : > { %1295 = vadd.xlane.f32.xlu1 %v1294_v11  ;;  %v1531_v15 = vsel %vm910_vm3, %v3830_v14, 0.0 }
 0x528   : > { %v3839_v22 = vpop.eup %2915 }
 0x529   : > { %v1641_v24 = vsel %vm910_vm3, %v3839_v22, 0.0 }
 0x52a   : > { %1422 = vadd.xlane.f32.xlu1 %v1421_v13 }
 0x52e   : > { %1532 = vadd.xlane.f32.xlu1 %v1531_v15 }
 0x534   : > { %1300 = vrot.lane.b32.xlu0 %v3718_v37, %s3252_s0  ;;  %v3843_v37 = vpop.eup %2917 }
 0x535   : > { %v1751_v25 = vsel %vm910_vm3, %v3843_v37, 0.0 }
 0x53f   : > { %1537 = vrot.lane.b32.xlu1 %v3726_v41, %s3249_s15 }
 0x553   : > { %1642 = vadd.xlane.f32.xlu0 %v1641_v24 }
 0x563   : > { %1752 = vadd.xlane.f32.xlu1 %v1751_v25 }
 0x569   : > { %1647 = vrot.lane.b32.xlu0 %v3726_v41, %s3251_s14 }
 0x574   : > { %1757 = vrot.lane.b32.xlu1 %v3726_v41, %s3252_s0 }
 0x576   : > { %v965_v27 = vpop.xlane.xlu0 %964 }
 0x577   : > { %2919 = vrcp.f32 %v965_v27 }
 0x57e   : > { %v1076_v28 = vpop.xlane.xlu1 %1075 }
 0x57f   : > { %2921 = vrcp.f32 %v1076_v28 }
 0x581   : > { %v2920_v29 = vpop.eup %2919 }
 0x582   : > { %v967_v30 = vmul.f32 %v2920_v29, %v2904_v54  ;;  %v1428_v38 = vpop.permute.xlu1 %1427 }
 0x583   : > { %v1433_v52 = vsel %vm974_vm4, %v1428_v38, 0 }
 0x584   : > { %v968_v31 = vpack.c.bf16 %v967_v30, %v967_v30 }
 0x586   : > { %2618 = vmatmul.mubr.msk.bf16.vlgmr.msra.gmra.mrb[4].mxu0 %vm910_vm3, %v968_v31 }
 0x587   : > { %2628 = vmatpush3.bf16.msra.mxu0 %v1086_v32  ;;  %2629 = vmatprep.mubr.msk.bf16.mxu0 %vm3241_vm2, %v3240_v17 }
 0x588   : > { %2639 = vmatprep.subr.bf16.mxu0 %v3240_v17 }
 0x589   : > { %v2922_v33 = vpop.eup %2921 }
 0x58a   : > { %v1078_v41 = vmul.f32 %v2922_v33, %v3812_v56 }
 0x58c   : > { %v1079_v34 = vpack.c.bf16 %v1078_v41, %v1078_v41 }
 0x58e   : > { %2630 = vmatmul.mubr.msk.bf16.vlgmr.msra.gmra.mrb[8].mxu0 %vm910_vm3, %v1079_v34  ;;  %v2891_v34 = vld [vmem:[%s3662_s9] sm:$0xff]  }
 0x58f   : > { %2640 = vmatpush3.bf16.msra.mxu0 %v1196_v35  ;;  %2641 = vmatprep.mubr.msk.bf16.mxu0 %vm3241_vm2, %v3240_v17 }
 0x590   : > { %2651 = vmatprep.subr.bf16.mxu0 %v3240_v17  ;;  %2706 = vmatpush3.bf16.msra.mxu1 %v2891_v34 }
 0x591   : > { %2707 = vmatprep.subr.bf16.mxu1 %v3240_v17 }
 0x5ab   : > { %v1186_v36 = vpop.xlane.xlu0 %1185 }
 0x5ac   : > { %2923 = vrcp.f32 %v1186_v36 }
 0x5af   : > { %v1301_v44 = vpop.permute.xlu0 %1300 }
 0x5b0   : > { %v1306_v46 = vsel %vm974_vm4, %v1301_v44, 0 }
 0x5b3   : > { %v1296_v39 = vpop.xlane.xlu1 %1295 }
 0x5b4   : > { %2925 = vrcp.f32 %v1296_v39 }
 0x5b6   : > { %v2924_v40 = vpop.eup %2923 }
 0x5b7   : > { %v1188_v42 = vmul.f32 %v2924_v40, %v2908_v7  ;;  %v1423_v43 = vpop.xlane.xlu1 %1422 }
 0x5b8   : > { %2927 = vrcp.f32 %v1423_v43 }
 0x5b9   : > { %v1189_v45 = vpack.c.bf16 %v1188_v42, %v1188_v42  ;;  %v2892_v42 = vld [vmem:[%s3662_s9 + $0x8] sm:$0xff]   ;;  %s4126_s9 = scalar_lea.vmem [#allocation4], %s3611_s29 }
 0x5ba   : > { %2708 = vmatpush3.bf16.msra.mxu1 %v2892_v42 }
 0x5bb   : > { %2642 = vmatmul.mubr.msk.bf16.vlgmr.msra.gmra.mrb[12].mxu0 %vm910_vm3, %v1189_v45  ;;  %v1533_v47 = vpop.xlane.xlu1 %1532  ;;  %2721 = vmatprep.subr.bf16.mxu1 %v3240_v17 }
 0x5bc   : > { %2652 = vmatpush3.bf16.msra.mxu0 %v1306_v46  ;;  %2653 = vmatprep.mubr.msk.bf16.mxu0 %vm3241_vm2, %v3240_v17  ;;  %2929 = vrcp.f32 %v1533_v47 }
 0x5bd   : > { %2663 = vmatprep.subr.bf16.mxu0 %v3240_v17 }
 0x5be   : > { %v2926_v48 = vpop.eup %2925 }
 0x5bf   : > { %v1298_v49 = vmul.f32 %v2926_v48, %v3822_v10  ;;  %v1538_v54 = vpop.permute.xlu1 %1537 }
 0x5c0   : > { %v1543_v57 = vsel %vm974_vm4, %v1538_v54, 0 }
 0x5c1   : > { %v1299_v50 = vpack.c.bf16 %v1298_v49, %v1298_v49 }
 0x5c2   : > { %v2928_v51 = vpop.eup %2927 }
 0x5c3   : > { %2654 = vmatmul.mubr.msk.bf16.vlgmr.msra.gmra.mrb[16].mxu0 %vm910_vm3, %v1299_v50  ;;  %v1425_v53 = vmul.f32 %v2928_v51, %v3826_v12 }
 0x5c4   : > { %2664 = vmatpush3.bf16.msra.mxu0 %v1433_v52  ;;  %2665 = vmatprep.mubr.msk.bf16.mxu0 %vm3241_vm2, %v3240_v17 }
 0x5c5   : > { %2675 = vmatprep.subr.bf16.mxu0 %v3240_v17  ;;  %v1426_v55 = vpack.c.bf16 %v1425_v53, %v1425_v53 }
 0x5c6   : > { %v2930_v56 = vpop.eup %2929 }
 0x5c7   : > { %v1535_v58 = vmul.f32 %v2930_v56, %v3830_v14 }
 0x5c9   : > { %v1536_v59 = vpack.c.bf16 %v1535_v58, %v1535_v58 }
 0x5cb   : > { %2666 = vmatmul.mubr.msk.bf16.vlgmr.msra.gmra.mrb[20].mxu0 %vm910_vm3, %v1426_v55 }
 0x5cc   : > { %2676 = vmatpush3.bf16.msra.mxu0 %v1543_v57  ;;  %2677 = vmatprep.mubr.msk.bf16.mxu0 %vm3241_vm2, %v3240_v17 }
 0x5cd   : > { %2687 = vmatprep.subr.bf16.mxu0 %v3240_v17 }
 0x5d3   : > { %2678 = vmatmul.mubr.msk.bf16.vlgmr.msra.gmra.mrb[24].mxu0 %vm910_vm3, %v1536_v59 }
 0x5d4   : > { %2689 = vmatprep.mubr.msk.bf16.mxu0 %vm3241_vm2, %v3240_v17 }
 0x5e0   : > { %v1643_v60 = vpop.xlane.xlu0 %1642 }
 0x5e1   : > { %2931 = vrcp.f32 %v1643_v60 }
 0x5e4   : > { %v1648_v61 = vpop.permute.xlu0 %1647 }
 0x5e5   : > { %v1653_v62 = vsel %vm974_vm4, %v1648_v61, 0 }
 0x5e6   : > { %2688 = vmatpush3.bf16.msra.mxu0 %v1653_v62 }
 0x5e7   : > { %2699 = vmatprep.subr.bf16.mxu0 %v3240_v17 }
 0x5eb   : > { %v2932_v63 = vpop.eup %2931 }
 0x5ec   : > { %v1645_v0 = vmul.f32 %v2932_v63, %v3839_v22 }
 0x5ee   : > { %v1646_v1 = vpack.c.bf16 %v1645_v0, %v1645_v0  ;;  %v2524_v0 = vld [vmem:[%s4126_s9] ss:$0 sm:$0xff] }
 0x5f0   : > { %2690 = vmatmul.mubr.msk.bf16.vlgmr.msra.gmra.mrb[28].mxu0 %vm910_vm3, %v1646_v1  ;;  %v1753_v4 = vpop.xlane.xlu1 %1752 }
 0x5f1   : > { %2933 = vrcp.f32 %v1753_v4  ;;  %2701 = vmatprep.mubr.msk.bf16.mxu0 %vm3241_vm2, %v3240_v17 }
 0x5f4   : > { %v1758_v5 = vpop.permute.xlu1 %1757 }
 0x5f5   : > { %v1763_v6 = vsel %vm974_vm4, %v1758_v5, 0 }
 0x5f6   : > { %2700 = vmatpush3.bf16.msra.mxu0 %v1763_v6 }
 0x5f7   : > { %2713 = vmatprep.subr.bf16.mxu0 %v3240_v17 }
 0x5fb   : > { %v2934_v7 = vpop.eup %2933 }
 0x5fc   : > { %v1755_v8 = vmul.f32 %v2934_v7, %v3843_v37 }
 0x5fe   : > { %v1756_v9 = vpack.c.bf16 %v1755_v8, %v1755_v8 }
 0x600   : > { %2702 = vmatmul.mubr.msk.bf16.vlgmr.msra.gmra.mrb[32].mxu0 %vm910_vm3, %v1756_v9 }
 0x601   : > { %2717 = vmatprep.mubr.msk.bf16.mxu0 %vm3241_vm2, %v3240_v17 }
 0x659   : > { %v1012_v10 = vpop.f32.mrb[4].mxu0 }
 0x65a   : > { %v2619_v11 = vpop.f32.mrb[5].mxu0 }
 0x65b   : > { %v1015_v12 = vpop.f32.mrb[6].mxu0 }
 0x65c   : > { %v2620_v13 = vpop.f32.mrb[7].mxu0 }
 0x661   : > { %v1122_v14 = vpop.f32.mrb[8].mxu0 }
 0x662   : > { %v2631_v15 = vpop.f32.mrb[9].mxu0 }
 0x663   : > { %v1125_v16 = vpop.f32.mrb[10].mxu0 }
 0x664   : > { %v2632_v18 = vpop.f32.mrb[11].mxu0 }
 0x68e   : > { %v1232_v19 = vpop.f32.mrb[12].mxu0 }
 0x68f   : > { %v2643_v20 = vpop.f32.mrb[13].mxu0 }
 0x690   : > { %v1235_v21 = vpop.f32.mrb[14].mxu0 }
 0x691   : > { %v2644_v22 = vpop.f32.mrb[15].mxu0 }
 0x696   : > { %v1342_v23 = vpop.f32.mrb[16].mxu0 }
 0x697   : > { %v2655_v24 = vpop.f32.mrb[17].mxu0 }
 0x698   : > { %v1345_v37 = vpop.f32.mrb[18].mxu0  ;;  %v2893_v24 = vld [vmem:[%s3627_s4] sm:$0xff]  }
 0x699   : > { %v2656_v25 = vpop.f32.mrb[19].mxu0  ;;  %2714 = vmatpush3.bf16.msra.mxu0 %v2893_v24  ;;  %v2894_v37 = vld [vmem:[%s3627_s4 + $0x8] sm:$0xff]   ;;  %s4128_s4 = scalar_lea.vmem [#allocation9], %s3611_s29 }
 0x69a   : > { %2715 = vmatprep.subr.bf16.mxu0 %v3240_v17 }
 0x69d   : > { %2716 = vmatpush3.bf16.msra.mxu0 %v2894_v37 }
 0x69e   : > { %v1469_v26 = vpop.f32.mrb[20].mxu0 }
 0x69f   : > { %v2667_v27 = vpop.f32.mrb[21].mxu0 }
 0x6a0   : > { %v1472_v28 = vpop.f32.mrb[22].mxu0 }
 0x6a1   : > { %v2668_v29 = vpop.f32.mrb[23].mxu0 }
 0x6a6   : > { %v1579_v30 = vpop.f32.mrb[24].mxu0 }
 0x6a7   : > { %v2874_v31 = vpack.i.bf16 %v1579_v30, %v1122_v14  ;;  %v2679_v32 = vpop.f32.mrb[25].mxu0 }
 0x6a8   : > { %v1582_v33 = vpop.f32.mrb[26].mxu0 }
 0x6a9   : > { %2875 = vrot.lane.b32.xlu0 %v2874_v31, %s3253_s5  ;;  %v2680_v41 = vpop.f32.mrb[27].mxu0  ;;  %v2528_v33 = vld [vmem:[%s4127_s22] ss:$0 sm:$0xff] }
 0x6c3   : > { %v1689_v35 = vpop.f32.mrb[28].mxu0 }
 0x6c4   : > { %v2879_v36 = vpack.i.bf16 %v1689_v35, %v1232_v19  ;;  %v2691_v38 = vpop.f32.mrb[29].mxu0 }
 0x6c5   : > { %v1692_v39 = vpop.f32.mrb[30].mxu0 }
 0x6c6   : > { %2880 = vrot.lane.b32.xlu1 %v2879_v36, %s3254_s7  ;;  %v2692_v40 = vpop.f32.mrb[31].mxu0  ;;  %v2529_v36 = vld [vmem:[%s4128_s4] ss:$0 sm:$0xff] }
 0x6d3   : > { %v1799_v43 = vpop.f32.mrb[32].mxu0 }
 0x6d4   : > { %v2884_v44 = vpack.i.bf16 %v1799_v43, %v1342_v23  ;;  %v2703_v45 = vpop.f32.mrb[33].mxu0  ;;  %v2895_v43 = vld [vmem:[%s3672_s11] sm:$0xff]  }
 0x6d5   : > { %v1802_v46 = vpop.f32.mrb[34].mxu0  ;;  %v2897_v45 = vld [vmem:[%s3672_s11 + $0x10] sm:$0xff]  }
 0x6d6   : > { %2885 = vrot.lane.b32.xlu0 %v2884_v44, %s3255_s16  ;;  %v2704_v47 = vpop.f32.mrb[35].mxu0  ;;  %v2896_v44 = vld [vmem:[%s3672_s11 + $0x8] sm:$0xff]   ;;  %v2898_v46 = vld [vmem:[%s3672_s11 + $0x18] sm:$0xff]  }
 0x6d7   : > { %v2530_v47 = vld [vmem:[%s652_s18] ss:$0 sm:$0xff] }
 0x71b   : > { %v2876_v48 = vpop.permute.xlu0 %2875 }
 0x71c   : > { %v2878_v50 = vunpack.i.h.bf16 %v2876_v48  ;;  %v2877_v51 = vunpack.i.l.bf16 %v2876_v48 }
 0x71e   : > { %v1817_v55 = vsel %vm910_vm3, %v1469_v26, %v2878_v50  ;;  %v1360_v56 = vsel %vm910_vm3, %v1012_v10, %v2877_v51 }
 0x738   : > { %v2881_v49 = vpop.permute.xlu1 %2880 }
 0x739   : > { %v2883_v52 = vunpack.i.h.bf16 %v2881_v49  ;;  %v2882_v53 = vunpack.i.l.bf16 %v2881_v49 }
 0x73b   : > { %v1818_v59 = vsel %vm1361_vm5, %v1817_v55, %v2883_v52  ;;  %v1362_v60 = vsel %vm1361_vm5, %v1360_v56, %v2882_v53 }
 0x748   : > { %v2886_v54 = vpop.permute.xlu0 %2885 }
 0x749   : > { %v2888_v57 = vunpack.i.h.bf16 %v2886_v54  ;;  %v2887_v58 = vunpack.i.l.bf16 %v2886_v54 }
 0x74b   : > { %v1819_v61 = vsel %vm1363_vm6, %v1818_v59, %v2888_v57  ;;  %v1364_v62 = vsel %vm1363_vm6, %v1362_v60, %v2887_v58 }
 0x74c   : > { %v1820_v63 = vpack.c.bf16 %v1819_v61, %v1364_v62 }
 0x74e   : > { %2710 = vmatmul.mubr.msk.bf16.vlgmr.msra.gmra.mrb[32].mxu1 %vm801_vm1, %v1820_v63 }
 0x74f   : > { %2729 = vmatprep.mubr.msk.bf16.mxu1 %vm3241_vm2, %v3240_v17  ;;  %2722 = vmatpush3.bf16.msra.mxu1 %v2895_v43  ;;  %v2064_v43 = vld [vmem:[#allocation3] sm:$0xff] }
 0x750   : > { %2723 = vmatprep.subr.bf16.mxu1 %v3240_v17 }
 0x753   : > { %2724 = vmatpush3.bf16.msra.mxu1 %v2896_v44 }
 0x754   : > { %2725 = vmatprep.subr.bf16.mxu1 %v3240_v17 }
 0x757   : > { %2726 = vmatpush3.bf16.msra.mxu1 %v2897_v45  ;;  %v2065_v45 = vld [vmem:[#allocation3 + $0x8] sm:$0xff] }
 0x758   : > { %2727 = vmatprep.subr.bf16.mxu1 %v3240_v17 }
 0x75b   : > { %2728 = vmatpush3.bf16.msra.mxu1 %v2898_v46 }
 0x821   : > { %v1881_v1 = vpop.f32.mrb[32].mxu1 }
 0x822   : > { %v1882_v4 = vadd.f32 %v2524_v0, %v1881_v1  ;;  %v2711_v5 = vpop.f32.mrb[33].mxu1 }
 0x823   : > { %v1884_v6 = vpop.f32.mrb[34].mxu1 }
 0x824   : > { %v1888_v7 = vadd.f32 %v1882_v4, %v3679_v2  ;;  %v1885_v8 = vadd.f32 %v2524_v0, %v1884_v6  ;;  %v2712_v9 = vpop.f32.mrb[35].mxu1 }
 0x826   : > { %1890 = vst.msk [vmem:[#allocation2] sm:$0xff] %vm801_vm1, %v1888_v7  ;;  %v1889_v10 = vadd.f32 %v1885_v8, %v3681_v3 }
 0x828   : > { %1891 = vst.msk [vmem:[#allocation2 + $0x8] sm:$0xff] %vm801_vm1, %v1889_v10 }
 0x82d   : > { %v3911_v11 = vld [vmem:[#allocation2] sm:$0xff] }
 0x82e   : > { %v1899_v12 = vsel %vm801_vm1, %v3911_v11, 0.0 }
 0x82f   : > { %v3915_v13 = vld [vmem:[#allocation2 + $0x8] sm:$0xff]  ;;  %1900 = vadd.xlane.f32.xlu1 %v1899_v12 }
 0x830   : > { %v1902_v2 = vsel %vm801_vm1, %v3915_v13, 0.0 }
 0x831   : > { %1903 = vadd.xlane.f32.xlu0 %v1902_v2 }
 0x8bc   : > { %v1901_v14 = vpop.xlane.xlu1 %1900 }
 0x8bd   : > { %v1906_v15 = vmul.f32 0.03125, %v1901_v14 }
 0x8be   : > { %v1904_v16 = vpop.xlane.xlu0 %1903 }
 0x8bf   : > { %v1908_v3 = vsub.f32 %v3911_v11, %v1906_v15  ;;  %v1907_v18 = vmul.f32 0.03125, %v1904_v16 }
 0x8c1   : > { %v1909_v19 = vsub.f32 %v3915_v13, %v1907_v18  ;;  %v1910_v20 = vmul.f32 %v1908_v3, %v1908_v3 }
 0x8c3   : > { %v1912_v21 = vsel %vm801_vm1, %v1910_v20, 0.0  ;;  %v1911_v22 = vmul.f32 %v1909_v19, %v1909_v19 }
 0x8c4   : > { %1913 = vadd.xlane.f32.xlu0 %v1912_v21 }
 0x8c5   : > { %v1915_v23 = vsel %vm801_vm1, %v1911_v22, 0.0 }
 0x8c8   : > { %1916 = vadd.xlane.f32.xlu0 %v1915_v23 }
 0x951   : > { %v1914_v25 = vpop.xlane.xlu0 %1913 }
 0x952   : > { %v1918_v26 = vmul.f32 0.03125, %v1914_v25 }
 0x954   : > { %v1920_v27 = vadd.f32 1e-05, %v1918_v26 }
 0x955   : > { %v1917_v28 = vpop.xlane.xlu0 %1916 }
 0x956   : > { %2935 = vrsqrt.f32 %v1920_v27  ;;  %v1919_v29 = vmul.f32 0.03125, %v1917_v28 }
 0x958   : > { %v1921_v30 = vadd.f32 1e-05, %v1919_v29 }
 0x95a   : > { %2937 = vrsqrt.f32 %v1921_v30 }
 0x960   : > { %v2936_v31 = vpop.eup %2935 }
 0x961   : > { %v1924_v32 = vmul.f32 %v2936_v31, %v1908_v3 }
 0x963   : > { %v1932_v34 = vmul.f32 %v2528_v33, %v1924_v32 }
 0x964   : > { %v2938_v41 = vpop.eup %2937 }
 0x965   : > { %v1925_v35 = vmul.f32 %v2938_v41, %v1909_v19  ;;  %v1940_v39 = vadd.f32 %v2529_v36, %v1932_v34 }
 0x967   : > { %v1933_v38 = vmul.f32 %v2528_v33, %v1925_v35 }
 0x969   : > { %v1941_v40 = vadd.f32 %v2529_v36, %v1933_v38 }
 0x96b   : > { %v1942_v42 = vpack.c.bf16 %v1941_v40, %v1940_v39 }
 0x96d   : > { %2718 = vmatmul.mubr.msk.bf16.vlgmr.msra.gmra.mrb[36].mxu0 %vm801_vm1, %v1942_v42 }
 0xa40   : > { %v2003_v48 = vpop.f32.mrb[36].mxu0 }
 0xa41   : > { %v2004_v49 = vadd.f32 %v2530_v47, %v2003_v48  ;;  %v2719_v50 = vpop.f32.mrb[37].mxu0 }
 0xa42   : > { %v2006_v51 = vpop.f32.mrb[38].mxu0 }
 0xa43   : > { %v2012_v52 = vmul.f32 0.70710677, %v2004_v49  ;;  %v2007_v53 = vadd.f32 %v2530_v47, %v2006_v51  ;;  %v2720_v54 = vpop.f32.mrb[39].mxu0  ;;  %v2010_v35 = vmul.f32 0.5, %v2004_v49  ;;  %v2539_v49 = vld [vmem:[%s780_s6] ss:$0 sm:$0xff] }
 0xa44   : > { %s4130_s6 = sld [smem:[#allocation40_spill]] (%p2168_p2) }
 0xa45   : > { %v2014_v55 = vand.u32 2147483647, %v2012_v52  ;;  %v2013_v56 = vmul.f32 0.70710677, %v2007_v53  ;;  %vm2054_vm7 = vcmp.ge.f32.partialorder %v2012_v52, 0.0  ;;  %v2011_v36 = vmul.f32 0.5, %v2007_v53 }
 0xa47   : > { %v2016_v57 = vmul.f32 0.3275911, %v2014_v55  ;;  %v2015_v58 = vand.u32 2147483647, %v2013_v56  ;;  %v2042_v17 = vsub.f32 0.0, %v2014_v55  ;;  %vm2055_vm8 = vcmp.ge.f32.partialorder %v2013_v56, 0.0 }
 0xa49   : > { %v2018_v59 = vadd.f32 1.0, %v2016_v57  ;;  %v2017_v60 = vmul.f32 0.3275911, %v2015_v58  ;;  %v2043_v62 = vsub.f32 0.0, %v2015_v58  ;;  %v2044_v0 = vmul.f32 %v2042_v17, %v2014_v55 }
 0xa4b   : > { %2939 = vrcp.f32 %v2018_v59  ;;  %v2019_v61 = vadd.f32 1.0, %v2017_v60  ;;  %v2045_v6 = vmul.f32 %v2043_v62, %v2015_v58  ;;  %v2046_v7 = vmul.f32 1.442695, %v2044_v0 }
 0xa4d   : > { %2941 = vrcp.f32 %v2019_v61  ;;  %v2048_v2 = vmul.f32 1.442695, %v2045_v6 }
 0xa4e   : > { %2943 = vpow2.f32 %v2046_v7 }
 0xa4f   : > { %2945 = vpow2.f32 %v2048_v2 }
 0xa55   : > { %v2940_v63 = vpop.eup %2939 }
 0xa56   : > { %v2024_v1 = vmul.f32 1.0614054, %v2940_v63 }
 0xa57   : > { %v2942_v4 = vpop.eup %2941 }
 0xa58   : > { %v2026_v5 = vadd.f32 -1.4531521, %v2024_v1  ;;  %v2025_v8 = vmul.f32 1.0614054, %v2942_v4  ;;  %v2944_v24 = vpop.eup %2943 }
 0xa59   : > { %v2946_v27 = vpop.eup %2945 }
 0xa5a   : > { %v2028_v9 = vmul.f32 %v2940_v63, %v2026_v5  ;;  %v2027_v10 = vadd.f32 -1.4531521, %v2025_v8 }
 0xa5c   : > { %v2030_v12 = vadd.f32 1.4214138, %v2028_v9  ;;  %v2029_v14 = vmul.f32 %v2942_v4, %v2027_v10 }
 0xa5e   : > { %v2032_v15 = vmul.f32 %v2940_v63, %v2030_v12  ;;  %v2031_v16 = vadd.f32 1.4214138, %v2029_v14 }
 0xa60   : > { %v2034_v3 = vadd.f32 -0.28449672, %v2032_v15  ;;  %v2033_v18 = vmul.f32 %v2942_v4, %v2031_v16  ;;  %v2541_v15 = vld [vmem:[%s4130_s6] ss:$0 sm:$0xff] (%p2168_p2) }
 0xa62   : > { %v2036_v19 = vmul.f32 %v2940_v63, %v2034_v3  ;;  %v2035_v20 = vadd.f32 -0.28449672, %v2033_v18  ;;  %v2542_v3 = vld [vmem:[%s4131_s8] ss:$0 sm:$0xff] (%p2168_p2) }
 0xa64   : > { %v2038_v21 = vadd.f32 0.2548296, %v2036_v19  ;;  %v2037_v22 = vmul.f32 %v2942_v4, %v2035_v20 }
 0xa66   : > { %v2040_v23 = vmul.f32 %v2940_v63, %v2038_v21  ;;  %v2039_v37 = vadd.f32 0.2548296, %v2037_v22 }
 0xa68   : > { %v2050_v25 = vmul.f32 %v2944_v24, %v2040_v23  ;;  %v2041_v26 = vmul.f32 %v2942_v4, %v2039_v37 }
 0xa6a   : > { %v2052_v28 = vsub.f32 1.0, %v2050_v25  ;;  %v2051_v29 = vmul.f32 %v2946_v27, %v2041_v26 }
 0xa6c   : > { %v2056_v30 = vsub.f32 0.0, %v2052_v28  ;;  %v2053_v31 = vsub.f32 1.0, %v2051_v29 }
 0xa6e   : > { %v2058_v32 = vsel %vm2054_vm7, %v2052_v28, %v2056_v30  ;;  %v2057_v33 = vsub.f32 0.0, %v2053_v31 }
 0xa6f   : > { %v2060_v41 = vadd.f32 1.0, %v2058_v32 }
 0xa70   : > { %v2059_v34 = vsel %vm2055_vm8, %v2053_v31, %v2057_v33 }
 0xa71   : > { %v2061_v38 = vadd.f32 1.0, %v2059_v34  ;;  %v2062_v39 = vmul.f32 %v2060_v41, %v2010_v35 }
 0xa73   : > { %v2063_v40 = vmul.f32 %v2061_v38, %v2011_v36 }
 0xa75   : > { %v2066_v42 = vpack.c.bf16 %v2063_v40, %v2062_v39 }
 0xa77   : > { %2730 = vmatmul.mubr.msk.bf16.vlgmr.msra.gmra.mrb[36].mxu1 %vm2099_vm9, %v2066_v42 }
 0xb4a   : > { %v2137_v44 = vpop.f32.mrb[36].mxu1 }
 0xb4b   : > { %v2144_v46 = vadd.f32 %v2137_v44, %v2064_v43  ;;  %v2731_v47 = vpop.f32.mrb[37].mxu1 }
 0xb4c   : > { %v2140_v48 = vpop.f32.mrb[38].mxu1 }
 0xb4d   : > { %2146 = vst.msk [vmem:[#allocation3] sm:$0xff] %vm801_vm1, %v2144_v46  ;;  %v2145_v50 = vadd.f32 %v2140_v48, %v2065_v45  ;;  %v2732_v51 = vpop.f32.mrb[39].mxu1 }
 0xb4f   : > { %2147 = vst.msk [vmem:[#allocation3 + $0x8] sm:$0xff] %vm801_vm1, %v2145_v50 }
 0xb54   : > { %v2151_v52 = vld [vmem:[#allocation3] sm:$0xff] }
 0xb55   : > { %v2160_v53 = vadd.f32 %v2539_v49, %v2151_v52  ;;  %2172 = sbr.rel (!%p2168_p2) target bundleno = 3231 (0xc9f), region = 112 }
 0xb56   : > { %v2152_v54 = vld [vmem:[#allocation3 + $0x8] sm:$0xff] }
 0xb57   : > { %v2164_v55 = vadd.f32 %v3911_v11, %v2160_v53  ;;  %v2161_v56 = vadd.f32 %v2539_v49, %v2152_v54 }
 0xb59   : > { %2166 = vst.msk [vmem:[#allocation2] sm:$0xff] %vm801_vm1, %v2164_v55  ;;  %v2165_v57 = vadd.f32 %v3915_v13, %v2161_v56 }
 0xb5b   : > { %2167 = vst.msk [vmem:[#allocation2 + $0x8] sm:$0xff] %vm801_vm1, %v2165_v57 }
 0xb60   : > { %v2173_v58 = vld [vmem:[#allocation2] sm:$0xff] }
 0xb61   : > { %v2177_v60 = vsel %vm801_vm1, %v2173_v58, 0.0 }
 0xb62   : > { %v2174_v59 = vld [vmem:[#allocation2 + $0x8] sm:$0xff]  ;;  %2178 = vadd.xlane.f32.xlu0 %v2177_v60 }
 0xb63   : > { %v2180_v61 = vsel %vm801_vm1, %v2174_v59, 0.0 }
 0xb66   : > { %2181 = vadd.xlane.f32.xlu0 %v2180_v61 }
 0xbef   : > { %v2179_v17 = vpop.xlane.xlu0 %2178 }
 0xbf0   : > { %v2183_v11 = vmul.f32 0.03125, %v2179_v17 }
 0xbf2   : > { %v2185_v62 = vsub.f32 %v2173_v58, %v2183_v11 }
 0xbf3   : > { %v2182_v63 = vpop.xlane.xlu0 %2181 }
 0xbf4   : > { %v2184_v0 = vmul.f32 0.03125, %v2182_v63  ;;  %v2187_v1 = vmul.f32 %v2185_v62, %v2185_v62 }
 0xbf6   : > { %v2186_v13 = vsub.f32 %v2174_v59, %v2184_v0  ;;  %v2189_v4 = vsel %vm801_vm1, %v2187_v1, 0.0 }
 0xbf7   : > { %2190 = vadd.xlane.f32.xlu1 %v2189_v4 }
 0xbf8   : > { %v2188_v5 = vmul.f32 %v2186_v13, %v2186_v13 }
 0xbfa   : > { %v2192_v6 = vsel %vm801_vm1, %v2188_v5, 0.0 }
 0xbfb   : > { %2193 = vadd.xlane.f32.xlu1 %v2192_v6 }
 0xc84   : > { %v2191_v7 = vpop.xlane.xlu1 %2190 }
 0xc85   : > { %v2195_v8 = vmul.f32 0.03125, %v2191_v7 }
 0xc87   : > { %v2197_v9 = vadd.f32 1e-05, %v2195_v8 }
 0xc88   : > { %v2194_v10 = vpop.xlane.xlu1 %2193 }
 0xc89   : > { %2947 = vrsqrt.f32 %v2197_v9  ;;  %v2196_v12 = vmul.f32 0.03125, %v2194_v10 }
 0xc8b   : > { %v2198_v2 = vadd.f32 1e-05, %v2196_v12 }
 0xc8d   : > { %2949 = vrsqrt.f32 %v2198_v2 }
 0xc93   : > { %v2948_v14 = vpop.eup %2947 }
 0xc94   : > { %v2201_v16 = vmul.f32 %v2948_v14, %v2185_v62 }
 0xc96   : > { %v2209_v18 = vmul.f32 %v2541_v15, %v2201_v16 }
 0xc97   : > { %v2950_v19 = vpop.eup %2949 }
 0xc98   : > { %v2217_v20 = vadd.f32 %v2542_v3, %v2209_v18  ;;  %v2202_v21 = vmul.f32 %v2950_v19, %v2186_v13 }
 0xc9a   : > { %2219 = vst.msk [vmem:[%s3675_s27] sm:$0xff] %vm801_vm1, %v2217_v20  ;;  %v2210_v22 = vmul.f32 %v2541_v15, %v2202_v21 }
 0xc9c   : > { %v2218_v23 = vadd.f32 %v2542_v3, %v2210_v22 }
 0xc9e   : > { %2220 = vst.msk [vmem:[%s3675_s27 + $0x8] sm:$0xff] %vm801_vm1, %v2218_v23 }
 0xc9f PF: > { %s4132_s28 = sld [smem:[#allocation27_spill]]  ;;  %s2554_s21 = sshll.u32 %s3219_s20, 8 }
 0xca0   : > { %s4133_s26 = sld [smem:[#allocation42_spill]]  ;;  %s2235_s15 = sshll.u32 %s3675_s27, 4  ;;  %s3975_s15 = int_to_ptr.vmem [resolvable:$true] %s2235_s15 }
 0xca1   : > { %s4134_s10 = sand.u32 1, %s3195_s30   ;;  %s3101_s0 = scalar_lea.vmem %s3975_s15, 256 }
 0xca2   : > { %s3979_s14 = scalar_lea.sflag [#allocation6], %s4134_s10  ;;  %p3102_p7 = scmp.ne.s32.totalorder %s3975_s15, %s3101_s0 }
 0xca3   : > { %s3256_s20 = smov [#allocation13]  }
 0xca4   : > { %s3105_s7 = sshll.u32 %s3256_s20, 4  ;;  %s3106_s7 = int_to_ptr.vmem [resolvable:$false] %s3105_s7 }
 0xca5   : > { %p4135_p4 = scmp.ne.s32.totalorder %s4132_s28, 0  ;;  %s3107_s16 = scalar_lea.vmem %s3106_s7, 512 }
 0xca6   : > { %s3972_s25 = scalar_lea.hbm %s4133_s26, %s2554_s21  ;;  %p3108_p10 = scmp.lt.s32.totalorder %s3975_s15, %s3106_s7 }
 0xca7   : > { %p3103_p3 = pnand %p3102_p7, %p4135_p4  ;;  %p3109_p11 = scmp.lt.s32.totalorder %s3107_s16, %s3101_s0 }
 0xca9   : > { %p3104_p5 = pneg %p3103_p3  ;;  %p3110_p0 = por %p3109_p11, %p3108_p10 }
 0xcab   : > { %p3111_p12 = pnand %p3110_p0, %p3104_p5 }
 0xcad   : > { %3114 = shalt.err (!%p3111_p12)
}
 0xcae   : > { %s3115_s27 = scalar_lea.hbm %s3972_s25, 256  ;;  %s3119_s4 = scalar_lea.hbm %s4133_s26, 512 }
 0xcaf   : > { %p3116_p8 = scmp.ne.s32.totalorder %s3972_s25, %s3115_s27  ;;  %p3120_p1 = scmp.lt.u32.totalorder %s3972_s25, %s4133_s26 }
 0xcb0   : > { %p3121_p13 = scmp.lt.u32.totalorder %s3119_s4, %s3115_s27  ;;  %p3123_p7 = scmp.lt.u32.totalorder %s3115_s27, %s3972_s25 }
 0xcb1   : > { %p3117_p6 = pnand %p3116_p8, %p4135_p4 }
 0xcb2   : > { %p3122_p2 = por %p3121_p13, %p3120_p1 }
 0xcb3   : > { %p3118_p9 = pneg %p3117_p6 }
 0xcb4   : > { %p3124_p3 = por %p3123_p7, %p3122_p2 }
 0xcb6   : > { %p3125_p5 = pnand %p3124_p3, %p3118_p9 }
 0xcb8   : > { %3128 = shalt.err (!%p3125_p5)
}
 0xcb9   : > { %s3257_s18 = smov 128  }
 0xcba   : > { %2743 = dma.vmem_to_hbm [thread:$0]  (%p4135_p4), %s3975_s15, 256, %s3972_s25, %s3979_s14, %s3257_s18, %s3257_s18, %s3253_s5  }
 0xcbb PF: > { %s4136_s19 = sld [smem:[#allocation18_spill]]  ;;  %s4137_s13 = sld [smem:[#allocation28_spill]] }
 0xcbc   : > { %p2766_p10 = scmp.ge.s32.totalorder %s3231_s23, 2 }
 0xcc1   : > { %s2250_s6 = sand.u32 1, %s4136_s19   ;;  %p4138_p11 = scmp.ne.s32.totalorder %s4137_s13, 0 }
 0xcc2   : > { %s2251_s12 = scalar_lea.sflag [#allocation6], %s2250_s6 }
 0xcc3   : > { %p2762_p0 = pnand %p2766_p10, %p4138_p11 }
 0xcc5   : > { %3186 = dma.done.wait (!%p2762_p0), %s2251_s12, 256  }
 0xcc6   : > { %3188 = vsyncadd (!%p2762_p0), %s2251_s12, 4294967040  ;;  %s36_s23 = sadd.s32 1, %s3231_s23   ;;  %s4139_s24 = sld [smem:[#allocation19_spill]] }
 0xcc7   : > { %p33_p12 = scmp.ge.s32.totalorder %s36_s23, 6   ;;  %s4140_s15 = sld [smem:[#allocation26_spill]] }
 0xcc8   : > { %s4141_s8 = sld [smem:[#allocation20_spill]]  ;;  %s4142_s18 = sld [smem:[#allocation25_spill]] }
 0xcc9   : > { %s4143_s19 = sld [smem:[#allocation21_spill]]  ;;  %s4144_s20 = sld [smem:[#allocation22_spill]] }
 0xcca   : > { %s4145_s21 = sld [smem:[#allocation23_spill]]  ;;  %s4146_s22 = sld [smem:[#allocation24_spill]] }
 0xccb   : > { %s4147_s29 = smov %s3195_s30  ;;  %s4149_s16 = smov %s3207_s17 }
 0xccc   : > { %s4148_s30 = smov %s4139_s24  ;;  %35 = sbr.rel (!%p33_p12) target bundleno = 28 (0x1c), region = 206 }
 0xcce   : > { %s4150_s17 = smov %s4141_s8 }
 0xcd3   :  { %2256 = vsyncpa [#allocation5], 1 }
 0xcd4   :  { %2258 = vsyncpa [#allocation5 + $0x1], 1 }
 0xcd5   :  { %2259 = vsyncpa [#allocation8], 1 }
 0xcd6   :  { %2261 = vsyncpa [#allocation8 + $0x1], 1 }
 0xcd7   :  { %2262 = vsyncpa [#allocation11], 1 }
 0xcd8   :  { %2264 = vsyncpa [#allocation11 + $0x1], 1 }
 0xcd9   :  { %2265 = vsyncpa [#allocation6], 1 }
 0xcda   :  { %2267 = vsyncpa [#allocation6 + $0x1], 1 }

</bundles_post_ra>
